<compile_context>
chip_gen: v7x
topology: tpu7x:2x2x1
jax: 0.10.0
libtpu: 0.0.40
codegen_flags: <defaults>
</compile_context>

<pallas_src>
import math
import functools

import jax
import jax.numpy as jnp
import numpy as np
from jax.experimental import pallas as pl
from jax.experimental.pallas import tpu as pltpu

EPS = 1e-5


def _layernorm(x, w, b):
    mu = jnp.mean(x, axis=-1, keepdims=True)
    var = jnp.mean((x - mu) ** 2, axis=-1, keepdims=True)
    return (x - mu) * jax.lax.rsqrt(var + EPS) * w + b


def _gelu_exact(x):
    # PyTorch nn.GELU() default: exact erf formulation.
    return 0.5 * x * (1.0 + jax.lax.erf(x * (1.0 / math.sqrt(2.0))))


def _gelu_tanh(x):
    # EUP-resident approximation (optional; changes numerics vs. exact GELU).
    c = math.sqrt(2.0 / math.pi)
    return 0.5 * x * (1.0 + jnp.tanh(c * (x + 0.044715 * x * x * x)))


def prenorm_block_kernel(
    x_ref,
    ln1w_ref, ln1b_ref,
    wqkv_ref, bqkv_ref,      # pre-transposed [E, 3E]; q columns pre-scaled by 1/sqrt(dh)
    wo_ref, bo_ref,          # pre-transposed [E, E]
    ln2w_ref, ln2b_ref,
    w1_ref, b1_ref,          # pre-transposed [E, hid]
    w2_ref, b2_ref,          # pre-transposed [hid, E]
    o_ref,
    *, emb_dim, heads, seq, bb, mm_dtype, approx_recip, gelu_approx,
):
    E = emb_dim
    dh = E // heads
    M = bb * seq

    # [bb, S, E] -> [M, E]: fold the batch block into the matmul row dimension.
    x = x_ref[...].reshape(M, E)

    # ---- LayerNorm 1 (f32) ----
    xn = _layernorm(x, ln1w_ref[0], ln1b_ref[0])

    # ---- Multi-head self-attention (PyTorch MultiheadAttention semantics) ----
    # in_proj: qkv = xn @ Wqkv^T + bqkv; 1/sqrt(dh) already folded into q cols.
    qkv = jnp.dot(xn.astype(mm_dtype), wqkv_ref[...],
                  preferred_element_type=jnp.float32) + bqkv_ref[0]    # [M, 3E] f32
    qkv3 = qkv.reshape(bb, seq, 3 * E)

    def heads_of(base):
        # -> [heads*bb, S, dh], head-major along the leading (batch) axis.
        parts = [qkv3[:, :, base + h * dh: base + (h + 1) * dh] for h in range(heads)]
        return jnp.concatenate(parts, axis=0) if heads > 1 else parts[0]

    qh = heads_of(0)          # pre-scaled
    kh = heads_of(E)
    vh = heads_of(2 * E)

    s = jnp.einsum("bqd,bkd->bqk", qh.astype(mm_dtype), kh.astype(mm_dtype),
                   preferred_element_type=jnp.float32)                 # [HB, S, S]
    s = s - jnp.max(s, axis=-1, keepdims=True)
    p = jnp.exp(s)
    denom = jnp.sum(p, axis=-1, keepdims=True)
    if approx_recip:
        p = p * pl.reciprocal(denom, approx=True)
    else:
        p = p / denom
    oh = jnp.einsum("bqk,bkd->bqd", p.astype(mm_dtype), vh.astype(mm_dtype),
                    preferred_element_type=jnp.float32)                # [HB, S, dh]

    if heads > 1:
        attn = jnp.concatenate([oh[h * bb:(h + 1) * bb] for h in range(heads)],
                               axis=-1)                                # [bb, S, E]
    else:
        attn = oh
    attn = attn.reshape(M, E)

    # out_proj
    attn = jnp.dot(attn.astype(mm_dtype), wo_ref[...],
                   preferred_element_type=jnp.float32) + bo_ref[0]

    # residual 1 (dropout1 identity in eval)
    x = x + attn

    # ---- LayerNorm 2 + MLP ----
    xn2 = _layernorm(x, ln2w_ref[0], ln2b_ref[0])
    h1 = jnp.dot(xn2.astype(mm_dtype), w1_ref[...],
                 preferred_element_type=jnp.float32) + b1_ref[0]
    h1 = _gelu_tanh(h1) if gelu_approx else _gelu_exact(h1)
    h2 = jnp.dot(h1.astype(mm_dtype), w2_ref[...],
                 preferred_element_type=jnp.float32) + b2_ref[0]

    # residual 2 (dropout2 identity in eval)
    o_ref[...] = (x + h2).reshape(bb, seq, E).astype(o_ref.dtype)


def prepare_params(params, *, emb_dim, heads, matmul_dtype=jnp.bfloat16):
    """One-time weight prep (hoisted out of the hot path).

    Pre-transposes the matmul weights so every in-kernel RHS is
    lane-contiguous, casts them to the MXU dtype, and folds the 1/sqrt(dh)
    attention scale into the q columns of W_qkv / b_qkv.
    """
    (ln1w, ln1b, wqkv, bqkv, wo, bo, ln2w, ln2b, w1, b1, w2, b2) = params
    dh = emb_dim // heads
    scale = 1.0 / math.sqrt(dh)
    col_scale = jnp.concatenate([
        jnp.full((emb_dim,), scale, jnp.float32),
        jnp.ones((2 * emb_dim,), jnp.float32)])

    wqkv_t = (wqkv.T * col_scale[None, :]).astype(matmul_dtype)   # [E, 3E]
    bqkv_s = (bqkv * col_scale[None, :]).astype(jnp.float32)      # [1, 3E]
    wo_t = wo.T.astype(matmul_dtype)                              # [E, E]
    w1_t = w1.T.astype(matmul_dtype)                              # [E, hid]
    w2_t = w2.T.astype(matmul_dtype)                              # [hid, E]
    return (ln1w, ln1b, wqkv_t, bqkv_s, wo_t, bo, ln2w, ln2b, w1_t, b1, w2_t, b2)


def _default_vmem_limit_bytes():
    # Budget ~75% of the chip's VMEM: leaves headroom for compiler scratch and
    # the x/out double buffers (48 MiB on v7x's 64 MiB, ~96 MiB on v5e/v6e).
    try:
        cap = pltpu.get_tpu_info().vmem_capacity_bytes
        return int(cap) * 3 // 4
    except Exception:
        return 48 * 1024 * 1024


def prenorm_transformer_block(x, prepared_params, *, emb_dim, heads,
                              rows_per_tile=256, approx_recip=True,
                              gelu_approx=False, vmem_limit_bytes=None):
    B, S, E = x.shape
    assert E == emb_dim and E % heads == 0

    (ln1w, ln1b, wqkv_t, bqkv, wo_t, bo,
     ln2w, ln2b, w1_t, b1, w2_t, b2) = prepared_params
    mm_dtype = wqkv_t.dtype

    # Grid policy: fold batch elements into each step so the matmul row dim
    # approaches `rows_per_tile`.  No forced >=2 split: on single-TC chips
    # (v5e/v6e) the grid is a serial loop, so splitting only shrinks M and adds
    # per-step overhead.  (v6e: consider rows_per_tile=512 when it fits.)
    cdiv = lambda a, b: -(-a // b)
    steps = max(1, min(B, cdiv(B * S, rows_per_tile)))
    bb = cdiv(B, steps)
    grid_b = cdiv(B, bb)
    B_pad = bb * grid_b
    if B_pad != B:
        x = jnp.pad(x, ((0, B_pad - B), (0, 0), (0, 0)))

    kernel = functools.partial(
        prenorm_block_kernel, emb_dim=E, heads=heads, seq=S, bb=bb,
        mm_dtype=mm_dtype, approx_recip=approx_recip, gelu_approx=gelu_approx)

    if vmem_limit_bytes is None:
        vmem_limit_bytes = _default_vmem_limit_bytes()

    def _call(use_buffered):
        def invariant_spec(a):
            # Loop-invariant weights/biases/LN params: single-buffer them so the
            # auto-pipeline doesn't allocate 2x VMEM for data that never changes.
            idx = lambda b, _nd=a.ndim: (0,) * _nd
            if use_buffered:
                return pl.BlockSpec(a.shape, idx, pipeline_mode=pl.Buffered(1))
            return pl.BlockSpec(a.shape, idx)

        return pl.pallas_call(
            kernel,
            out_shape=jax.ShapeDtypeStruct((B_pad, S, E), x.dtype),
            grid_spec=pltpu.PrefetchScalarGridSpec(
                num_scalar_prefetch=0,
                grid=(grid_b,),
                in_specs=[
                    pl.BlockSpec((bb, S, E), lambda b: (b, 0, 0)),   # x
                    invariant_spec(ln1w), invariant_spec(ln1b),
                    invariant_spec(wqkv_t), invariant_spec(bqkv),
                    invariant_spec(wo_t), invariant_spec(bo),
                    invariant_spec(ln2w), invariant_spec(ln2b),
                    invariant_spec(w1_t), invariant_spec(b1),
                    invariant_spec(w2_t), invariant_spec(b2),
                ],
                out_specs=pl.BlockSpec((bb, S, E), lambda b: (b, 0, 0)),
            ),
            compiler_params=pltpu.CompilerParams(
                dimension_semantics=("parallel",),
                vmem_limit_bytes=vmem_limit_bytes,
            ),
        )(x, ln1w, ln1b, wqkv_t, bqkv, wo_t, bo, ln2w, ln2b, w1_t, b1, w2_t, b2)

    use_buffered = hasattr(pl, "Buffered")
    try:
        out = _call(use_buffered)
    except Exception:
        if not use_buffered:
            raise
        out = _call(False)   # toolchain without pipeline_mode=Buffered(1)

    return out[:B]


def init_params(key, emb_dim, mlp_dim):
    """Deterministic synthetic parameters (shapes match the PyTorch module)."""
    ks = jax.random.split(key, 8)
    hid = mlp_dim * 2
    sd = 0.05
    ln1w = jnp.ones((1, emb_dim), jnp.float32)
    ln1b = jnp.zeros((1, emb_dim), jnp.float32)
    wqkv = sd * jax.random.normal(ks[0], (3 * emb_dim, emb_dim), jnp.float32)
    bqkv = sd * jax.random.normal(ks[1], (1, 3 * emb_dim), jnp.float32)
    wo = sd * jax.random.normal(ks[2], (emb_dim, emb_dim), jnp.float32)
    bo = sd * jax.random.normal(ks[3], (1, emb_dim), jnp.float32)
    ln2w = jnp.ones((1, emb_dim), jnp.float32)
    ln2b = jnp.zeros((1, emb_dim), jnp.float32)
    w1 = sd * jax.random.normal(ks[4], (hid, emb_dim), jnp.float32)
    b1 = sd * jax.random.normal(ks[5], (1, hid), jnp.float32)
    w2 = sd * jax.random.normal(ks[6], (emb_dim, hid), jnp.float32)
    b2 = sd * jax.random.normal(ks[7], (1, emb_dim), jnp.float32)
    return (ln1w, ln1b, wqkv, bqkv, wo, bo, ln2w, ln2b, w1, b1, w2, b2)


def reference(x, params, *, emb_dim, heads):
    """Plain-JAX f32 reference matching PyTorch semantics (eval mode)."""
    (ln1w, ln1b, wqkv, bqkv, wo, bo, ln2w, ln2b, w1, b1, w2, b2) = params
    B, S, E = x.shape
    dh = E // heads

    def ln(v, w, b):
        mu = v.mean(-1, keepdims=True)
        var = ((v - mu) ** 2).mean(-1, keepdims=True)
        return (v - mu) / jnp.sqrt(var + EPS) * w[0] + b[0]

    xn = ln(x, ln1w, ln1b)
    qkv = jnp.einsum("bse,fe->bsf", xn, wqkv) + bqkv[0]
    q, k, v = jnp.split(qkv, 3, axis=-1)
    q = q.reshape(B, S, heads, dh).transpose(0, 2, 1, 3) / math.sqrt(dh)
    k = k.reshape(B, S, heads, dh).transpose(0, 2, 1, 3)
    v = v.reshape(B, S, heads, dh).transpose(0, 2, 1, 3)
    s = jnp.einsum("bhqd,bhkd->bhqk", q, k)
    p = jax.nn.softmax(s, axis=-1)
    o = jnp.einsum("bhqk,bhkd->bhqd", p, v).transpose(0, 2, 1, 3).reshape(B, S, E)
    attn = jnp.einsum("bse,fe->bsf", o, wo) + bo[0]
    x = x + attn
    xn2 = ln(x, ln2w, ln2b)
    h1 = jnp.einsum("bse,fe->bsf", xn2, w1) + b1[0]
    h1 = 0.5 * h1 * (1.0 + jax.lax.erf(h1 / math.sqrt(2.0)))
    h2 = jnp.einsum("bsf,ef->bse", h1, w2) + b2[0]
    return x + h2


if __name__ == "__main__":
    emb_dim, heads, mlp_dim = 32, 4, 32
    B, S = 2, 8

    key = jax.random.PRNGKey(0)
    kx, kp = jax.random.split(key)
    x = jax.random.normal(kx, (B, S, emb_dim), jnp.float32)
    params = init_params(kp, emb_dim, mlp_dim)

    # One-time weight prep (transpose / bf16 cast / scale fold) outside the
    # hot path — reuse `prepared` across calls.
    prepared = prepare_params(params, emb_dim=emb_dim, heads=heads)

    out = prenorm_transformer_block(x, prepared, emb_dim=emb_dim, heads=heads)
    out = jax.block_until_ready(out)

    ref = reference(x, params, emb_dim=emb_dim, heads=heads)
    # Tolerance loosened vs. pure-f32 because matmul operands are bf16
    # (f32 accumulation); LN/softmax/GELU remain f32.
    np.testing.assert_allclose(np.asarray(out), np.asarray(ref), rtol=2e-2, atol=2e-2)

    print("KERNEL_OK")
</pallas_src>

<mosaic_0001>
module attributes {stable_mosaic.version = 11 : i64} {
  func.func @prenorm_block_kernel(%arg0: i32, %arg1: memref<2x8x32xf32, #tpu.memory_space<vmem>>, %arg2: memref<1x32xf32, #tpu.memory_space<vmem>>, %arg3: memref<1x32xf32, #tpu.memory_space<vmem>>, %arg4: memref<32x96xbf16, #tpu.memory_space<vmem>>, %arg5: memref<1x96xf32, #tpu.memory_space<vmem>>, %arg6: memref<32x32xbf16, #tpu.memory_space<vmem>>, %arg7: memref<1x32xf32, #tpu.memory_space<vmem>>, %arg8: memref<1x32xf32, #tpu.memory_space<vmem>>, %arg9: memref<1x32xf32, #tpu.memory_space<vmem>>, %arg10: memref<32x64xbf16, #tpu.memory_space<vmem>>, %arg11: memref<1x64xf32, #tpu.memory_space<vmem>>, %arg12: memref<64x32xbf16, #tpu.memory_space<vmem>>, %arg13: memref<1x32xf32, #tpu.memory_space<vmem>>, %arg14: memref<2x8x32xf32, #tpu.memory_space<vmem>>) attributes {dimension_semantics = [#tpu.dimension_semantics<parallel>], iteration_bounds = array<i64: 1>, scalar_prefetch = 0 : i64, scratch_operands = 0 : i64, tpu.core_type = #tpu.core_type<tc>, window_params = [{transform_indices = @transform_0, window_bounds = array<i64: 2, 8, 32>}, {pipeline_mode = #tpu.pipeline_mode<synchronous>, transform_indices = @transform_1, window_bounds = array<i64: 1, 32>}, {pipeline_mode = #tpu.pipeline_mode<synchronous>, transform_indices = @transform_2, window_bounds = array<i64: 1, 32>}, {pipeline_mode = #tpu.pipeline_mode<synchronous>, transform_indices = @transform_3, window_bounds = array<i64: 32, 96>}, {pipeline_mode = #tpu.pipeline_mode<synchronous>, transform_indices = @transform_4, window_bounds = array<i64: 1, 96>}, {pipeline_mode = #tpu.pipeline_mode<synchronous>, transform_indices = @transform_5, window_bounds = array<i64: 32, 32>}, {pipeline_mode = #tpu.pipeline_mode<synchronous>, transform_indices = @transform_6, window_bounds = array<i64: 1, 32>}, {pipeline_mode = #tpu.pipeline_mode<synchronous>, transform_indices = @transform_7, window_bounds = array<i64: 1, 32>}, {pipeline_mode = #tpu.pipeline_mode<synchronous>, transform_indices = @transform_8, window_bounds = array<i64: 1, 32>}, {pipeline_mode = #tpu.pipeline_mode<synchronous>, transform_indices = @transform_9, window_bounds = array<i64: 32, 64>}, {pipeline_mode = #tpu.pipeline_mode<synchronous>, transform_indices = @transform_10, window_bounds = array<i64: 1, 64>}, {pipeline_mode = #tpu.pipeline_mode<synchronous>, transform_indices = @transform_11, window_bounds = array<i64: 64, 32>}, {pipeline_mode = #tpu.pipeline_mode<synchronous>, transform_indices = @transform_12, window_bounds = array<i64: 1, 32>}, {transform_indices = @transform_13, window_bounds = array<i64: 2, 8, 32>}]} {
    %c0 = arith.constant 0 : index
    %c0_0 = arith.constant 0 : index
    %c0_1 = arith.constant 0 : index
    %0 = vector.load %arg1[%c0, %c0_0, %c0_1] : memref<2x8x32xf32, #tpu.memory_space<vmem>>, vector<2x8x32xf32>
    %1 = vector.shape_cast %0 : vector<2x8x32xf32> to vector<16x32xf32>
    %c0_2 = arith.constant 0 : index
    %c0_3 = arith.constant 0 : index
    %2 = vector.load %arg2[%c0_2, %c0_3] : memref<1x32xf32, #tpu.memory_space<vmem>>, vector<1x32xf32>
    %3 = vector.shape_cast %2 : vector<1x32xf32> to vector<32xf32>
    %c0_4 = arith.constant 0 : index
    %c0_5 = arith.constant 0 : index
    %4 = vector.load %arg3[%c0_4, %c0_5] : memref<1x32xf32, #tpu.memory_space<vmem>>, vector<1x32xf32>
    %5 = vector.shape_cast %4 : vector<1x32xf32> to vector<32xf32>
    %cst = arith.constant dense<0.000000e+00> : vector<16xf32>
    %6 = vector.multi_reduction <add>, %1, %cst [1] : vector<16x32xf32> to vector<16xf32>
    %7 = vector.shape_cast %6 : vector<16xf32> to vector<16x1xf32>
    %cst_6 = arith.constant 3.200000e+01 : f32
    %8 = vector.broadcast %cst_6 : f32 to vector<16x1xf32>
    %9 = arith.divf %7, %8 : vector<16x1xf32>
    %10 = vector.broadcast %9 : vector<16x1xf32> to vector<16x32xf32>
    %11 = arith.subf %1, %10 : vector<16x32xf32>
    %12 = arith.mulf %11, %11 : vector<16x32xf32>
    %cst_7 = arith.constant dense<0.000000e+00> : vector<16xf32>
    %13 = vector.multi_reduction <add>, %12, %cst_7 [1] : vector<16x32xf32> to vector<16xf32>
    %14 = vector.shape_cast %13 : vector<16xf32> to vector<16x1xf32>
    %cst_8 = arith.constant 3.200000e+01 : f32
    %15 = vector.broadcast %cst_8 : f32 to vector<16x1xf32>
    %16 = arith.divf %14, %15 : vector<16x1xf32>
    %17 = vector.broadcast %9 : vector<16x1xf32> to vector<16x32xf32>
    %18 = arith.subf %1, %17 : vector<16x32xf32>
    %cst_9 = arith.constant 9.99999974E-6 : f32
    %19 = vector.broadcast %cst_9 : f32 to vector<16x1xf32>
    %20 = arith.addf %16, %19 : vector<16x1xf32>
    %21 = math.rsqrt %20 : vector<16x1xf32>
    %22 = vector.broadcast %21 : vector<16x1xf32> to vector<16x32xf32>
    %23 = arith.mulf %18, %22 : vector<16x32xf32>
    %24 = vector.shape_cast %3 : vector<32xf32> to vector<1x32xf32>
    %25 = vector.broadcast %24 : vector<1x32xf32> to vector<16x32xf32>
    %26 = arith.mulf %23, %25 : vector<16x32xf32>
    %27 = vector.shape_cast %5 : vector<32xf32> to vector<1x32xf32>
    %28 = vector.broadcast %27 : vector<1x32xf32> to vector<16x32xf32>
    %29 = arith.addf %26, %28 : vector<16x32xf32>
    %30 = arith.truncf %29 : vector<16x32xf32> to vector<16x32xbf16>
    %c0_10 = arith.constant 0 : index
    %c0_11 = arith.constant 0 : index
    %31 = vector.load %arg4[%c0_10, %c0_11] : memref<32x96xbf16, #tpu.memory_space<vmem>>, vector<32x96xbf16>
    %cst_12 = arith.constant dense<0.000000e+00> : vector<16x96xf32>
    %32 = tpu.matmul %30, %31, %cst_12 {dimension_numbers = #tpu.dot_dimension_numbers<[1], [0], [0], [1], [0, 0, 1, 1], [], []>} : vector<16x32xbf16>, vector<32x96xbf16>, vector<16x96xf32> -> vector<16x96xf32>
    %c0_13 = arith.constant 0 : index
    %c0_14 = arith.constant 0 : index
    %33 = vector.load %arg5[%c0_13, %c0_14] : memref<1x96xf32, #tpu.memory_space<vmem>>, vector<1x96xf32>
    %34 = vector.shape_cast %33 : vector<1x96xf32> to vector<96xf32>
    %35 = vector.shape_cast %34 : vector<96xf32> to vector<1x96xf32>
    %36 = vector.broadcast %35 : vector<1x96xf32> to vector<16x96xf32>
    %37 = arith.addf %32, %36 : vector<16x96xf32>
    %38 = vector.shape_cast %37 : vector<16x96xf32> to vector<2x8x96xf32>
    %39 = vector.extract_strided_slice %38 {offsets = [0, 0, 0], sizes = [2, 8, 8], strides = [1, 1, 1]} : vector<2x8x96xf32> to vector<2x8x8xf32>
    %40 = vector.extract_strided_slice %38 {offsets = [0, 0, 8], sizes = [2, 8, 8], strides = [1, 1, 1]} : vector<2x8x96xf32> to vector<2x8x8xf32>
    %41 = vector.extract_strided_slice %38 {offsets = [0, 0, 16], sizes = [2, 8, 8], strides = [1, 1, 1]} : vector<2x8x96xf32> to vector<2x8x8xf32>
    %42 = vector.extract_strided_slice %38 {offsets = [0, 0, 24], sizes = [2, 8, 8], strides = [1, 1, 1]} : vector<2x8x96xf32> to vector<2x8x8xf32>
    %43 = tpu.concatenate %39, %40, %41, %42 in 0 : vector<2x8x8xf32>, vector<2x8x8xf32>, vector<2x8x8xf32>, vector<2x8x8xf32> -> vector<8x8x8xf32>
    %44 = vector.extract_strided_slice %38 {offsets = [0, 0, 32], sizes = [2, 8, 8], strides = [1, 1, 1]} : vector<2x8x96xf32> to vector<2x8x8xf32>
    %45 = vector.extract_strided_slice %38 {offsets = [0, 0, 40], sizes = [2, 8, 8], strides = [1, 1, 1]} : vector<2x8x96xf32> to vector<2x8x8xf32>
    %46 = vector.extract_strided_slice %38 {offsets = [0, 0, 48], sizes = [2, 8, 8], strides = [1, 1, 1]} : vector<2x8x96xf32> to vector<2x8x8xf32>
    %47 = vector.extract_strided_slice %38 {offsets = [0, 0, 56], sizes = [2, 8, 8], strides = [1, 1, 1]} : vector<2x8x96xf32> to vector<2x8x8xf32>
    %48 = tpu.concatenate %44, %45, %46, %47 in 0 : vector<2x8x8xf32>, vector<2x8x8xf32>, vector<2x8x8xf32>, vector<2x8x8xf32> -> vector<8x8x8xf32>
    %49 = vector.extract_strided_slice %38 {offsets = [0, 0, 64], sizes = [2, 8, 8], strides = [1, 1, 1]} : vector<2x8x96xf32> to vector<2x8x8xf32>
    %50 = vector.extract_strided_slice %38 {offsets = [0, 0, 72], sizes = [2, 8, 8], strides = [1, 1, 1]} : vector<2x8x96xf32> to vector<2x8x8xf32>
    %51 = vector.extract_strided_slice %38 {offsets = [0, 0, 80], sizes = [2, 8, 8], strides = [1, 1, 1]} : vector<2x8x96xf32> to vector<2x8x8xf32>
    %52 = vector.extract_strided_slice %38 {offsets = [0, 0, 88], sizes = [2, 8, 8], strides = [1, 1, 1]} : vector<2x8x96xf32> to vector<2x8x8xf32>
    %53 = tpu.concatenate %49, %50, %51, %52 in 0 : vector<2x8x8xf32>, vector<2x8x8xf32>, vector<2x8x8xf32>, vector<2x8x8xf32> -> vector<8x8x8xf32>
    %54 = arith.truncf %43 : vector<8x8x8xf32> to vector<8x8x8xbf16>
    %55 = arith.truncf %48 : vector<8x8x8xf32> to vector<8x8x8xbf16>
    "tpu.trace_start"() <{level = 10 : i32, message = "bqd,bkd->bqk"}> : () -> ()
    %cst_15 = arith.constant dense<0.000000e+00> : vector<8x8x8xf32>
    %56 = tpu.matmul %54, %55, %cst_15 {dimension_numbers = #tpu.dot_dimension_numbers<[2], [2], [1], [1], [0, 0, 0, 1, 1, 1], [0], [0]>} : vector<8x8x8xbf16>, vector<8x8x8xbf16>, vector<8x8x8xf32> -> vector<8x8x8xf32>
    "tpu.trace_stop"() : () -> ()
    %cst_16 = arith.constant dense<0xFF800000> : vector<8x8xf32>
    %57 = vector.multi_reduction <maximumf>, %56, %cst_16 [2] : vector<8x8x8xf32> to vector<8x8xf32>
    %58 = vector.shape_cast %57 : vector<8x8xf32> to vector<8x8x1xf32>
    %59 = vector.broadcast %58 : vector<8x8x1xf32> to vector<8x8x8xf32>
    %60 = arith.subf %56, %59 : vector<8x8x8xf32>
    %61 = math.exp %60 : vector<8x8x8xf32>
    %cst_17 = arith.constant dense<0.000000e+00> : vector<8x8xf32>
    %62 = vector.multi_reduction <add>, %61, %cst_17 [2] : vector<8x8x8xf32> to vector<8x8xf32>
    %63 = vector.shape_cast %62 : vector<8x8xf32> to vector<8x8x1xf32>
    %64 = tpu.reciprocal %63 {approx = true} : vector<8x8x1xf32> -> vector<8x8x1xf32>
    %65 = vector.broadcast %64 : vector<8x8x1xf32> to vector<8x8x8xf32>
    %66 = arith.mulf %61, %65 : vector<8x8x8xf32>
    %67 = arith.truncf %66 : vector<8x8x8xf32> to vector<8x8x8xbf16>
    %68 = arith.truncf %53 : vector<8x8x8xf32> to vector<8x8x8xbf16>
    "tpu.trace_start"() <{level = 10 : i32, message = "bqk,bkd->bqd"}> : () -> ()
    %cst_18 = arith.constant dense<0.000000e+00> : vector<8x8x8xf32>
    %69 = tpu.matmul %67, %68, %cst_18 {dimension_numbers = #tpu.dot_dimension_numbers<[2], [1], [1], [2], [0, 0, 0, 1, 1, 2], [0], [0]>} : vector<8x8x8xbf16>, vector<8x8x8xbf16>, vector<8x8x8xf32> -> vector<8x8x8xf32>
    "tpu.trace_stop"() : () -> ()
    %70 = vector.extract_strided_slice %69 {offsets = [0, 0, 0], sizes = [2, 8, 8], strides = [1, 1, 1]} : vector<8x8x8xf32> to vector<2x8x8xf32>
    %71 = vector.extract_strided_slice %69 {offsets = [2, 0, 0], sizes = [2, 8, 8], strides = [1, 1, 1]} : vector<8x8x8xf32> to vector<2x8x8xf32>
    %72 = vector.extract_strided_slice %69 {offsets = [4, 0, 0], sizes = [2, 8, 8], strides = [1, 1, 1]} : vector<8x8x8xf32> to vector<2x8x8xf32>
    %73 = vector.extract_strided_slice %69 {offsets = [6, 0, 0], sizes = [2, 8, 8], strides = [1, 1, 1]} : vector<8x8x8xf32> to vector<2x8x8xf32>
    %74 = tpu.concatenate %70, %71, %72, %73 in 2 : vector<2x8x8xf32>, vector<2x8x8xf32>, vector<2x8x8xf32>, vector<2x8x8xf32> -> vector<2x8x32xf32>
    %75 = vector.shape_cast %74 : vector<2x8x32xf32> to vector<16x32xf32>
    %76 = arith.truncf %75 : vector<16x32xf32> to vector<16x32xbf16>
    %c0_19 = arith.constant 0 : index
    %c0_20 = arith.constant 0 : index
    %77 = vector.load %arg6[%c0_19, %c0_20] : memref<32x32xbf16, #tpu.memory_space<vmem>>, vector<32x32xbf16>
    %cst_21 = arith.constant dense<0.000000e+00> : vector<16x32xf32>
    %78 = tpu.matmul %76, %77, %cst_21 {dimension_numbers = #tpu.dot_dimension_numbers<[1], [0], [0], [1], [0, 0, 1, 1], [], []>} : vector<16x32xbf16>, vector<32x32xbf16>, vector<16x32xf32> -> vector<16x32xf32>
    %c0_22 = arith.constant 0 : index
    %c0_23 = arith.constant 0 : index
    %79 = vector.load %arg7[%c0_22, %c0_23] : memref<1x32xf32, #tpu.memory_space<vmem>>, vector<1x32xf32>
    %80 = vector.shape_cast %79 : vector<1x32xf32> to vector<32xf32>
    %81 = vector.shape_cast %80 : vector<32xf32> to vector<1x32xf32>
    %82 = vector.broadcast %81 : vector<1x32xf32> to vector<16x32xf32>
    %83 = arith.addf %78, %82 : vector<16x32xf32>
    %84 = arith.addf %1, %83 : vector<16x32xf32>
    %c0_24 = arith.constant 0 : index
    %c0_25 = arith.constant 0 : index
    %85 = vector.load %arg8[%c0_24, %c0_25] : memref<1x32xf32, #tpu.memory_space<vmem>>, vector<1x32xf32>
    %86 = vector.shape_cast %85 : vector<1x32xf32> to vector<32xf32>
    %c0_26 = arith.constant 0 : index
    %c0_27 = arith.constant 0 : index
    %87 = vector.load %arg9[%c0_26, %c0_27] : memref<1x32xf32, #tpu.memory_space<vmem>>, vector<1x32xf32>
    %88 = vector.shape_cast %87 : vector<1x32xf32> to vector<32xf32>
    %cst_28 = arith.constant dense<0.000000e+00> : vector<16xf32>
    %89 = vector.multi_reduction <add>, %84, %cst_28 [1] : vector<16x32xf32> to vector<16xf32>
    %90 = vector.shape_cast %89 : vector<16xf32> to vector<16x1xf32>
    %cst_29 = arith.constant 3.200000e+01 : f32
    %91 = vector.broadcast %cst_29 : f32 to vector<16x1xf32>
    %92 = arith.divf %90, %91 : vector<16x1xf32>
    %93 = vector.broadcast %92 : vector<16x1xf32> to vector<16x32xf32>
    %94 = arith.subf %84, %93 : vector<16x32xf32>
    %95 = arith.mulf %94, %94 : vector<16x32xf32>
    %cst_30 = arith.constant dense<0.000000e+00> : vector<16xf32>
    %96 = vector.multi_reduction <add>, %95, %cst_30 [1] : vector<16x32xf32> to vector<16xf32>
    %97 = vector.shape_cast %96 : vector<16xf32> to vector<16x1xf32>
    %cst_31 = arith.constant 3.200000e+01 : f32
    %98 = vector.broadcast %cst_31 : f32 to vector<16x1xf32>
    %99 = arith.divf %97, %98 : vector<16x1xf32>
    %100 = vector.broadcast %92 : vector<16x1xf32> to vector<16x32xf32>
    %101 = arith.subf %84, %100 : vector<16x32xf32>
    %cst_32 = arith.constant 9.99999974E-6 : f32
    %102 = vector.broadcast %cst_32 : f32 to vector<16x1xf32>
    %103 = arith.addf %99, %102 : vector<16x1xf32>
    %104 = math.rsqrt %103 : vector<16x1xf32>
    %105 = vector.broadcast %104 : vector<16x1xf32> to vector<16x32xf32>
    %106 = arith.mulf %101, %105 : vector<16x32xf32>
    %107 = vector.shape_cast %86 : vector<32xf32> to vector<1x32xf32>
    %108 = vector.broadcast %107 : vector<1x32xf32> to vector<16x32xf32>
    %109 = arith.mulf %106, %108 : vector<16x32xf32>
    %110 = vector.shape_cast %88 : vector<32xf32> to vector<1x32xf32>
    %111 = vector.broadcast %110 : vector<1x32xf32> to vector<16x32xf32>
    %112 = arith.addf %109, %111 : vector<16x32xf32>
    %113 = arith.truncf %112 : vector<16x32xf32> to vector<16x32xbf16>
    %c0_33 = arith.constant 0 : index
    %c0_34 = arith.constant 0 : index
    %114 = vector.load %arg10[%c0_33, %c0_34] : memref<32x64xbf16, #tpu.memory_space<vmem>>, vector<32x64xbf16>
    %cst_35 = arith.constant dense<0.000000e+00> : vector<16x64xf32>
    %115 = tpu.matmul %113, %114, %cst_35 {dimension_numbers = #tpu.dot_dimension_numbers<[1], [0], [0], [1], [0, 0, 1, 1], [], []>} : vector<16x32xbf16>, vector<32x64xbf16>, vector<16x64xf32> -> vector<16x64xf32>
    %c0_36 = arith.constant 0 : index
    %c0_37 = arith.constant 0 : index
    %116 = vector.load %arg11[%c0_36, %c0_37] : memref<1x64xf32, #tpu.memory_space<vmem>>, vector<1x64xf32>
    %117 = vector.shape_cast %116 : vector<1x64xf32> to vector<64xf32>
    %118 = vector.shape_cast %117 : vector<64xf32> to vector<1x64xf32>
    %119 = vector.broadcast %118 : vector<1x64xf32> to vector<16x64xf32>
    %120 = arith.addf %115, %119 : vector<16x64xf32>
    %cst_38 = arith.constant 5.000000e-01 : f32
    %121 = vector.broadcast %cst_38 : f32 to vector<16x64xf32>
    %122 = arith.mulf %121, %120 : vector<16x64xf32>
    %cst_39 = arith.constant 0.707106769 : f32
    %123 = vector.broadcast %cst_39 : f32 to vector<16x64xf32>
    %124 = arith.mulf %120, %123 : vector<16x64xf32>
    %125 = math.erf %124 : vector<16x64xf32>
    %cst_40 = arith.constant 1.000000e+00 : f32
    %126 = vector.broadcast %cst_40 : f32 to vector<16x64xf32>
    %127 = arith.addf %126, %125 : vector<16x64xf32>
    %128 = arith.mulf %122, %127 : vector<16x64xf32>
    %129 = arith.truncf %128 : vector<16x64xf32> to vector<16x64xbf16>
    %c0_41 = arith.constant 0 : index
    %c0_42 = arith.constant 0 : index
    %130 = vector.load %arg12[%c0_41, %c0_42] : memref<64x32xbf16, #tpu.memory_space<vmem>>, vector<64x32xbf16>
    %cst_43 = arith.constant dense<0.000000e+00> : vector<16x32xf32>
    %131 = tpu.matmul %129, %130, %cst_43 {dimension_numbers = #tpu.dot_dimension_numbers<[1], [0], [0], [1], [0, 0, 1, 1], [], []>} : vector<16x64xbf16>, vector<64x32xbf16>, vector<16x32xf32> -> vector<16x32xf32>
    %c0_44 = arith.constant 0 : index
    %c0_45 = arith.constant 0 : index
    %132 = vector.load %arg13[%c0_44, %c0_45] : memref<1x32xf32, #tpu.memory_space<vmem>>, vector<1x32xf32>
    %133 = vector.shape_cast %132 : vector<1x32xf32> to vector<32xf32>
    %134 = vector.shape_cast %133 : vector<32xf32> to vector<1x32xf32>
    %135 = vector.broadcast %134 : vector<1x32xf32> to vector<16x32xf32>
    %136 = arith.addf %131, %135 : vector<16x32xf32>
    %137 = arith.addf %84, %136 : vector<16x32xf32>
    %138 = vector.shape_cast %137 : vector<16x32xf32> to vector<2x8x32xf32>
    %c0_46 = arith.constant 0 : index
    %c0_47 = arith.constant 0 : index
    %c0_48 = arith.constant 0 : index
    %139 = vector.load %arg14[%c0_46, %c0_47, %c0_48] : memref<2x8x32xf32, #tpu.memory_space<vmem>>, vector<2x8x32xf32>
    tpu.vector_store %arg14[%c0_46, %c0_47, %c0_48], %138 {strides = array<i32>} : memref<2x8x32xf32, #tpu.memory_space<vmem>>, vector<2x8x32xf32>,
    return
  }
  func.func @transform_0(%arg0: i32) -> (i32, i32, i32) {
    %c0_i32 = arith.constant 0 : i32
    %c0_i32_0 = arith.constant 0 : i32
    %c0_i32_1 = arith.constant 0 : i32
    return %arg0, %c0_i32, %c0_i32_0 : i32, i32, i32
  }
  func.func @transform_1(%arg0: i32) -> (i32, i32) {
    %c0_i32 = arith.constant 0 : i32
    %c0_i32_0 = arith.constant 0 : i32
    %c0_i32_1 = arith.constant 0 : i32
    return %c0_i32, %c0_i32_0 : i32, i32
  }
  func.func @transform_2(%arg0: i32) -> (i32, i32) {
    %c0_i32 = arith.constant 0 : i32
    %c0_i32_0 = arith.constant 0 : i32
    %c0_i32_1 = arith.constant 0 : i32
    return %c0_i32, %c0_i32_0 : i32, i32
  }
  func.func @transform_3(%arg0: i32) -> (i32, i32) {
    %c0_i32 = arith.constant 0 : i32
    %c0_i32_0 = arith.constant 0 : i32
    %c0_i32_1 = arith.constant 0 : i32
    return %c0_i32, %c0_i32_0 : i32, i32
  }
  func.func @transform_4(%arg0: i32) -> (i32, i32) {
    %c0_i32 = arith.constant 0 : i32
    %c0_i32_0 = arith.constant 0 : i32
    %c0_i32_1 = arith.constant 0 : i32
    return %c0_i32, %c0_i32_0 : i32, i32
  }
  func.func @transform_5(%arg0: i32) -> (i32, i32) {
    %c0_i32 = arith.constant 0 : i32
    %c0_i32_0 = arith.constant 0 : i32
    %c0_i32_1 = arith.constant 0 : i32
    return %c0_i32, %c0_i32_0 : i32, i32
  }
  func.func @transform_6(%arg0: i32) -> (i32, i32) {
    %c0_i32 = arith.constant 0 : i32
    %c0_i32_0 = arith.constant 0 : i32
    %c0_i32_1 = arith.constant 0 : i32
    return %c0_i32, %c0_i32_0 : i32, i32
  }
  func.func @transform_7(%arg0: i32) -> (i32, i32) {
    %c0_i32 = arith.constant 0 : i32
    %c0_i32_0 = arith.constant 0 : i32
    %c0_i32_1 = arith.constant 0 : i32
    return %c0_i32, %c0_i32_0 : i32, i32
  }
  func.func @transform_8(%arg0: i32) -> (i32, i32) {
    %c0_i32 = arith.constant 0 : i32
    %c0_i32_0 = arith.constant 0 : i32
    %c0_i32_1 = arith.constant 0 : i32
    return %c0_i32, %c0_i32_0 : i32, i32
  }
  func.func @transform_9(%arg0: i32) -> (i32, i32) {
    %c0_i32 = arith.constant 0 : i32
    %c0_i32_0 = arith.constant 0 : i32
    %c0_i32_1 = arith.constant 0 : i32
    return %c0_i32, %c0_i32_0 : i32, i32
  }
  func.func @transform_10(%arg0: i32) -> (i32, i32) {
    %c0_i32 = arith.constant 0 : i32
    %c0_i32_0 = arith.constant 0 : i32
    %c0_i32_1 = arith.constant 0 : i32
    return %c0_i32, %c0_i32_0 : i32, i32
  }
  func.func @transform_11(%arg0: i32) -> (i32, i32) {
    %c0_i32 = arith.constant 0 : i32
    %c0_i32_0 = arith.constant 0 : i32
    %c0_i32_1 = arith.constant 0 : i32
    return %c0_i32, %c0_i32_0 : i32, i32
  }
  func.func @transform_12(%arg0: i32) -> (i32, i32) {
    %c0_i32 = arith.constant 0 : i32
    %c0_i32_0 = arith.constant 0 : i32
    %c0_i32_1 = arith.constant 0 : i32
    return %c0_i32, %c0_i32_0 : i32, i32
  }
  func.func @transform_13(%arg0: i32) -> (i32, i32, i32) {
    %c0_i32 = arith.constant 0 : i32
    %c0_i32_0 = arith.constant 0 : i32
    %c0_i32_1 = arith.constant 0 : i32
    return %arg0, %c0_i32, %c0_i32_0 : i32, i32, i32
  }
}

module attributes {stable_mosaic.version = 11 : i64} {
  func.func @prenorm_block_kernel(%arg0: i32, %arg1: memref<2x8x32xf32, #tpu.memory_space<vmem>>, %arg2: memref<1x32xf32, #tpu.memory_space<vmem>>, %arg3: memref<1x32xf32, #tpu.memory_space<vmem>>, %arg4: memref<32x96xbf16, #tpu.memory_space<vmem>>, %arg5: memref<1x96xf32, #tpu.memory_space<vmem>>, %arg6: memref<32x32xbf16, #tpu.memory_space<vmem>>, %arg7: memref<1x32xf32, #tpu.memory_space<vmem>>, %arg8: memref<1x32xf32, #tpu.memory_space<vmem>>, %arg9: memref<1x32xf32, #tpu.memory_space<vmem>>, %arg10: memref<32x64xbf16, #tpu.memory_space<vmem>>, %arg11: memref<1x64xf32, #tpu.memory_space<vmem>>, %arg12: memref<64x32xbf16, #tpu.memory_space<vmem>>, %arg13: memref<1x32xf32, #tpu.memory_space<vmem>>, %arg14: memref<2x8x32xf32, #tpu.memory_space<vmem>>) attributes {dimension_semantics = [#tpu.dimension_semantics<parallel>], iteration_bounds = array<i64: 1>, scalar_prefetch = 0 : i64, scratch_operands = 0 : i64, tpu.core_type = #tpu.core_type<tc>, window_params = [{transform_indices = @transform_0, window_bounds = array<i64: 2, 8, 32>}, {pipeline_mode = #tpu.pipeline_mode<synchronous>, transform_indices = @transform_1, window_bounds = array<i64: 1, 32>}, {pipeline_mode = #tpu.pipeline_mode<synchronous>, transform_indices = @transform_2, window_bounds = array<i64: 1, 32>}, {pipeline_mode = #tpu.pipeline_mode<synchronous>, transform_indices = @transform_3, window_bounds = array<i64: 32, 96>}, {pipeline_mode = #tpu.pipeline_mode<synchronous>, transform_indices = @transform_4, window_bounds = array<i64: 1, 96>}, {pipeline_mode = #tpu.pipeline_mode<synchronous>, transform_indices = @transform_5, window_bounds = array<i64: 32, 32>}, {pipeline_mode = #tpu.pipeline_mode<synchronous>, transform_indices = @transform_6, window_bounds = array<i64: 1, 32>}, {pipeline_mode = #tpu.pipeline_mode<synchronous>, transform_indices = @transform_7, window_bounds = array<i64: 1, 32>}, {pipeline_mode = #tpu.pipeline_mode<synchronous>, transform_indices = @transform_8, window_bounds = array<i64: 1, 32>}, {pipeline_mode = #tpu.pipeline_mode<synchronous>, transform_indices = @transform_9, window_bounds = array<i64: 32, 64>}, {pipeline_mode = #tpu.pipeline_mode<synchronous>, transform_indices = @transform_10, window_bounds = array<i64: 1, 64>}, {pipeline_mode = #tpu.pipeline_mode<synchronous>, transform_indices = @transform_11, window_bounds = array<i64: 64, 32>}, {pipeline_mode = #tpu.pipeline_mode<synchronous>, transform_indices = @transform_12, window_bounds = array<i64: 1, 32>}, {transform_indices = @transform_13, window_bounds = array<i64: 2, 8, 32>}]} {
    %c0 = arith.constant 0 : index
    %c0_0 = arith.constant 0 : index
    %c0_1 = arith.constant 0 : index
    %0 = vector.load %arg1[%c0, %c0_0, %c0_1] : memref<2x8x32xf32, #tpu.memory_space<vmem>>, vector<2x8x32xf32>
    %1 = vector.shape_cast %0 : vector<2x8x32xf32> to vector<16x32xf32>
    %c0_2 = arith.constant 0 : index
    %c0_3 = arith.constant 0 : index
    %2 = vector.load %arg2[%c0_2, %c0_3] : memref<1x32xf32, #tpu.memory_space<vmem>>, vector<1x32xf32>
    %3 = vector.shape_cast %2 : vector<1x32xf32> to vector<32xf32>
    %c0_4 = arith.constant 0 : index
    %c0_5 = arith.constant 0 : index
    %4 = vector.load %arg3[%c0_4, %c0_5] : memref<1x32xf32, #tpu.memory_space<vmem>>, vector<1x32xf32>
    %5 = vector.shape_cast %4 : vector<1x32xf32> to vector<32xf32>
    %cst = arith.constant dense<0.000000e+00> : vector<16xf32>
    %6 = vector.multi_reduction <add>, %1, %cst [1] : vector<16x32xf32> to vector<16xf32>
    %7 = vector.shape_cast %6 : vector<16xf32> to vector<16x1xf32>
    %cst_6 = arith.constant 3.200000e+01 : f32
    %8 = vector.broadcast %cst_6 : f32 to vector<16x1xf32>
    %9 = arith.divf %7, %8 : vector<16x1xf32>
    %10 = vector.broadcast %9 : vector<16x1xf32> to vector<16x32xf32>
    %11 = arith.subf %1, %10 : vector<16x32xf32>
    %12 = arith.mulf %11, %11 : vector<16x32xf32>
    %cst_7 = arith.constant dense<0.000000e+00> : vector<16xf32>
    %13 = vector.multi_reduction <add>, %12, %cst_7 [1] : vector<16x32xf32> to vector<16xf32>
    %14 = vector.shape_cast %13 : vector<16xf32> to vector<16x1xf32>
    %cst_8 = arith.constant 3.200000e+01 : f32
    %15 = vector.broadcast %cst_8 : f32 to vector<16x1xf32>
    %16 = arith.divf %14, %15 : vector<16x1xf32>
    %17 = vector.broadcast %9 : vector<16x1xf32> to vector<16x32xf32>
    %18 = arith.subf %1, %17 : vector<16x32xf32>
    %cst_9 = arith.constant 9.99999974E-6 : f32
    %19 = vector.broadcast %cst_9 : f32 to vector<16x1xf32>
    %20 = arith.addf %16, %19 : vector<16x1xf32>
    %21 = math.rsqrt %20 : vector<16x1xf32>
    %22 = vector.broadcast %21 : vector<16x1xf32> to vector<16x32xf32>
    %23 = arith.mulf %18, %22 : vector<16x32xf32>
    %24 = vector.shape_cast %3 : vector<32xf32> to vector<1x32xf32>
    %25 = vector.broadcast %24 : vector<1x32xf32> to vector<16x32xf32>
    %26 = arith.mulf %23, %25 : vector<16x32xf32>
    %27 = vector.shape_cast %5 : vector<32xf32> to vector<1x32xf32>
    %28 = vector.broadcast %27 : vector<1x32xf32> to vector<16x32xf32>
    %29 = arith.addf %26, %28 : vector<16x32xf32>
    %30 = arith.truncf %29 : vector<16x32xf32> to vector<16x32xbf16>
    %c0_10 = arith.constant 0 : index
    %c0_11 = arith.constant 0 : index
    %31 = vector.load %arg4[%c0_10, %c0_11] : memref<32x96xbf16, #tpu.memory_space<vmem>>, vector<32x96xbf16>
    %cst_12 = arith.constant dense<0.000000e+00> : vector<16x96xf32>
    %32 = tpu.matmul %30, %31, %cst_12 {dimension_numbers = #tpu.dot_dimension_numbers<[1], [0], [0], [1], [0, 0, 1, 1], [], []>} : vector<16x32xbf16>, vector<32x96xbf16>, vector<16x96xf32> -> vector<16x96xf32>
    %c0_13 = arith.constant 0 : index
    %c0_14 = arith.constant 0 : index
    %33 = vector.load %arg5[%c0_13, %c0_14] : memref<1x96xf32, #tpu.memory_space<vmem>>, vector<1x96xf32>
    %34 = vector.shape_cast %33 : vector<1x96xf32> to vector<96xf32>
    %35 = vector.shape_cast %34 : vector<96xf32> to vector<1x96xf32>
    %36 = vector.broadcast %35 : vector<1x96xf32> to vector<16x96xf32>
    %37 = arith.addf %32, %36 : vector<16x96xf32>
    %38 = vector.shape_cast %37 : vector<16x96xf32> to vector<2x8x96xf32>
    %39 = vector.extract_strided_slice %38 {offsets = [0, 0, 0], sizes = [2, 8, 8], strides = [1, 1, 1]} : vector<2x8x96xf32> to vector<2x8x8xf32>
    %40 = vector.extract_strided_slice %38 {offsets = [0, 0, 8], sizes = [2, 8, 8], strides = [1, 1, 1]} : vector<2x8x96xf32> to vector<2x8x8xf32>
    %41 = vector.extract_strided_slice %38 {offsets = [0, 0, 16], sizes = [2, 8, 8], strides = [1, 1, 1]} : vector<2x8x96xf32> to vector<2x8x8xf32>
    %42 = vector.extract_strided_slice %38 {offsets = [0, 0, 24], sizes = [2, 8, 8], strides = [1, 1, 1]} : vector<2x8x96xf32> to vector<2x8x8xf32>
    %43 = tpu.concatenate %39, %40, %41, %42 in 0 : vector<2x8x8xf32>, vector<2x8x8xf32>, vector<2x8x8xf32>, vector<2x8x8xf32> -> vector<8x8x8xf32>
    %44 = vector.extract_strided_slice %38 {offsets = [0, 0, 32], sizes = [2, 8, 8], strides = [1, 1, 1]} : vector<2x8x96xf32> to vector<2x8x8xf32>
    %45 = vector.extract_strided_slice %38 {offsets = [0, 0, 40], sizes = [2, 8, 8], strides = [1, 1, 1]} : vector<2x8x96xf32> to vector<2x8x8xf32>
    %46 = vector.extract_strided_slice %38 {offsets = [0, 0, 48], sizes = [2, 8, 8], strides = [1, 1, 1]} : vector<2x8x96xf32> to vector<2x8x8xf32>
    %47 = vector.extract_strided_slice %38 {offsets = [0, 0, 56], sizes = [2, 8, 8], strides = [1, 1, 1]} : vector<2x8x96xf32> to vector<2x8x8xf32>
    %48 = tpu.concatenate %44, %45, %46, %47 in 0 : vector<2x8x8xf32>, vector<2x8x8xf32>, vector<2x8x8xf32>, vector<2x8x8xf32> -> vector<8x8x8xf32>
    %49 = vector.extract_strided_slice %38 {offsets = [0, 0, 64], sizes = [2, 8, 8], strides = [1, 1, 1]} : vector<2x8x96xf32> to vector<2x8x8xf32>
    %50 = vector.extract_strided_slice %38 {offsets = [0, 0, 72], sizes = [2, 8, 8], strides = [1, 1, 1]} : vector<2x8x96xf32> to vector<2x8x8xf32>
    %51 = vector.extract_strided_slice %38 {offsets = [0, 0, 80], sizes = [2, 8, 8], strides = [1, 1, 1]} : vector<2x8x96xf32> to vector<2x8x8xf32>
    %52 = vector.extract_strided_slice %38 {offsets = [0, 0, 88], sizes = [2, 8, 8], strides = [1, 1, 1]} : vector<2x8x96xf32> to vector<2x8x8xf32>
    %53 = tpu.concatenate %49, %50, %51, %52 in 0 : vector<2x8x8xf32>, vector<2x8x8xf32>, vector<2x8x8xf32>, vector<2x8x8xf32> -> vector<8x8x8xf32>
    %54 = arith.truncf %43 : vector<8x8x8xf32> to vector<8x8x8xbf16>
    %55 = arith.truncf %48 : vector<8x8x8xf32> to vector<8x8x8xbf16>
    "tpu.trace_start"() <{level = 10 : i32, message = "bqd,bkd->bqk"}> : () -> ()
    %cst_15 = arith.constant dense<0.000000e+00> : vector<8x8x8xf32>
    %56 = tpu.matmul %54, %55, %cst_15 {dimension_numbers = #tpu.dot_dimension_numbers<[2], [2], [1], [1], [0, 0, 0, 1, 1, 1], [0], [0]>} : vector<8x8x8xbf16>, vector<8x8x8xbf16>, vector<8x8x8xf32> -> vector<8x8x8xf32>
    "tpu.trace_stop"() : () -> ()
    %cst_16 = arith.constant dense<0xFF800000> : vector<8x8xf32>
    %57 = vector.multi_reduction <maximumf>, %56, %cst_16 [2] : vector<8x8x8xf32> to vector<8x8xf32>
    %58 = vector.shape_cast %57 : vector<8x8xf32> to vector<8x8x1xf32>
    %59 = vector.broadcast %58 : vector<8x8x1xf32> to vector<8x8x8xf32>
    %60 = arith.subf %56, %59 : vector<8x8x8xf32>
    %61 = math.exp %60 : vector<8x8x8xf32>
    %cst_17 = arith.constant dense<0.000000e+00> : vector<8x8xf32>
    %62 = vector.multi_reduction <add>, %61, %cst_17 [2] : vector<8x8x8xf32> to vector<8x8xf32>
    %63 = vector.shape_cast %62 : vector<8x8xf32> to vector<8x8x1xf32>
    %64 = tpu.reciprocal %63 {approx = true} : vector<8x8x1xf32> -> vector<8x8x1xf32>
    %65 = vector.broadcast %64 : vector<8x8x1xf32> to vector<8x8x8xf32>
    %66 = arith.mulf %61, %65 : vector<8x8x8xf32>
    %67 = arith.truncf %66 : vector<8x8x8xf32> to vector<8x8x8xbf16>
    %68 = arith.truncf %53 : vector<8x8x8xf32> to vector<8x8x8xbf16>
    "tpu.trace_start"() <{level = 10 : i32, message = "bqk,bkd->bqd"}> : () -> ()
    %cst_18 = arith.constant dense<0.000000e+00> : vector<8x8x8xf32>
    %69 = tpu.matmul %67, %68, %cst_18 {dimension_numbers = #tpu.dot_dimension_numbers<[2], [1], [1], [2], [0, 0, 0, 1, 1, 2], [0], [0]>} : vector<8x8x8xbf16>, vector<8x8x8xbf16>, vector<8x8x8xf32> -> vector<8x8x8xf32>
    "tpu.trace_stop"() : () -> ()
    %70 = vector.extract_strided_slice %69 {offsets = [0, 0, 0], sizes = [2, 8, 8], strides = [1, 1, 1]} : vector<8x8x8xf32> to vector<2x8x8xf32>
    %71 = vector.extract_strided_slice %69 {offsets = [2, 0, 0], sizes = [2, 8, 8], strides = [1, 1, 1]} : vector<8x8x8xf32> to vector<2x8x8xf32>
    %72 = vector.extract_strided_slice %69 {offsets = [4, 0, 0], sizes = [2, 8, 8], strides = [1, 1, 1]} : vector<8x8x8xf32> to vector<2x8x8xf32>
    %73 = vector.extract_strided_slice %69 {offsets = [6, 0, 0], sizes = [2, 8, 8], strides = [1, 1, 1]} : vector<8x8x8xf32> to vector<2x8x8xf32>
    %74 = tpu.concatenate %70, %71, %72, %73 in 2 : vector<2x8x8xf32>, vector<2x8x8xf32>, vector<2x8x8xf32>, vector<2x8x8xf32> -> vector<2x8x32xf32>
    %75 = vector.shape_cast %74 : vector<2x8x32xf32> to vector<16x32xf32>
    %76 = arith.truncf %75 : vector<16x32xf32> to vector<16x32xbf16>
    %c0_19 = arith.constant 0 : index
    %c0_20 = arith.constant 0 : index
    %77 = vector.load %arg6[%c0_19, %c0_20] : memref<32x32xbf16, #tpu.memory_space<vmem>>, vector<32x32xbf16>
    %cst_21 = arith.constant dense<0.000000e+00> : vector<16x32xf32>
    %78 = tpu.matmul %76, %77, %cst_21 {dimension_numbers = #tpu.dot_dimension_numbers<[1], [0], [0], [1], [0, 0, 1, 1], [], []>} : vector<16x32xbf16>, vector<32x32xbf16>, vector<16x32xf32> -> vector<16x32xf32>
    %c0_22 = arith.constant 0 : index
    %c0_23 = arith.constant 0 : index
    %79 = vector.load %arg7[%c0_22, %c0_23] : memref<1x32xf32, #tpu.memory_space<vmem>>, vector<1x32xf32>
    %80 = vector.shape_cast %79 : vector<1x32xf32> to vector<32xf32>
    %81 = vector.shape_cast %80 : vector<32xf32> to vector<1x32xf32>
    %82 = vector.broadcast %81 : vector<1x32xf32> to vector<16x32xf32>
    %83 = arith.addf %78, %82 : vector<16x32xf32>
    %84 = arith.addf %1, %83 : vector<16x32xf32>
    %c0_24 = arith.constant 0 : index
    %c0_25 = arith.constant 0 : index
    %85 = vector.load %arg8[%c0_24, %c0_25] : memref<1x32xf32, #tpu.memory_space<vmem>>, vector<1x32xf32>
    %86 = vector.shape_cast %85 : vector<1x32xf32> to vector<32xf32>
    %c0_26 = arith.constant 0 : index
    %c0_27 = arith.constant 0 : index
    %87 = vector.load %arg9[%c0_26, %c0_27] : memref<1x32xf32, #tpu.memory_space<vmem>>, vector<1x32xf32>
    %88 = vector.shape_cast %87 : vector<1x32xf32> to vector<32xf32>
    %cst_28 = arith.constant dense<0.000000e+00> : vector<16xf32>
    %89 = vector.multi_reduction <add>, %84, %cst_28 [1] : vector<16x32xf32> to vector<16xf32>
    %90 = vector.shape_cast %89 : vector<16xf32> to vector<16x1xf32>
    %cst_29 = arith.constant 3.200000e+01 : f32
    %91 = vector.broadcast %cst_29 : f32 to vector<16x1xf32>
    %92 = arith.divf %90, %91 : vector<16x1xf32>
    %93 = vector.broadcast %92 : vector<16x1xf32> to vector<16x32xf32>
    %94 = arith.subf %84, %93 : vector<16x32xf32>
    %95 = arith.mulf %94, %94 : vector<16x32xf32>
    %cst_30 = arith.constant dense<0.000000e+00> : vector<16xf32>
    %96 = vector.multi_reduction <add>, %95, %cst_30 [1] : vector<16x32xf32> to vector<16xf32>
    %97 = vector.shape_cast %96 : vector<16xf32> to vector<16x1xf32>
    %cst_31 = arith.constant 3.200000e+01 : f32
    %98 = vector.broadcast %cst_31 : f32 to vector<16x1xf32>
    %99 = arith.divf %97, %98 : vector<16x1xf32>
    %100 = vector.broadcast %92 : vector<16x1xf32> to vector<16x32xf32>
    %101 = arith.subf %84, %100 : vector<16x32xf32>
    %cst_32 = arith.constant 9.99999974E-6 : f32
    %102 = vector.broadcast %cst_32 : f32 to vector<16x1xf32>
    %103 = arith.addf %99, %102 : vector<16x1xf32>
    %104 = math.rsqrt %103 : vector<16x1xf32>
    %105 = vector.broadcast %104 : vector<16x1xf32> to vector<16x32xf32>
    %106 = arith.mulf %101, %105 : vector<16x32xf32>
    %107 = vector.shape_cast %86 : vector<32xf32> to vector<1x32xf32>
    %108 = vector.broadcast %107 : vector<1x32xf32> to vector<16x32xf32>
    %109 = arith.mulf %106, %108 : vector<16x32xf32>
    %110 = vector.shape_cast %88 : vector<32xf32> to vector<1x32xf32>
    %111 = vector.broadcast %110 : vector<1x32xf32> to vector<16x32xf32>
    %112 = arith.addf %109, %111 : vector<16x32xf32>
    %113 = arith.truncf %112 : vector<16x32xf32> to vector<16x32xbf16>
    %c0_33 = arith.constant 0 : index
    %c0_34 = arith.constant 0 : index
    %114 = vector.load %arg10[%c0_33, %c0_34] : memref<32x64xbf16, #tpu.memory_space<vmem>>, vector<32x64xbf16>
    %cst_35 = arith.constant dense<0.000000e+00> : vector<16x64xf32>
    %115 = tpu.matmul %113, %114, %cst_35 {dimension_numbers = #tpu.dot_dimension_numbers<[1], [0], [0], [1], [0, 0, 1, 1], [], []>} : vector<16x32xbf16>, vector<32x64xbf16>, vector<16x64xf32> -> vector<16x64xf32>
    %c0_36 = arith.constant 0 : index
    %c0_37 = arith.constant 0 : index
    %116 = vector.load %arg11[%c0_36, %c0_37] : memref<1x64xf32, #tpu.memory_space<vmem>>, vector<1x64xf32>
    %117 = vector.shape_cast %116 : vector<1x64xf32> to vector<64xf32>
    %118 = vector.shape_cast %117 : vector<64xf32> to vector<1x64xf32>
    %119 = vector.broadcast %118 : vector<1x64xf32> to vector<16x64xf32>
    %120 = arith.addf %115, %119 : vector<16x64xf32>
    %cst_38 = arith.constant 5.000000e-01 : f32
    %121 = vector.broadcast %cst_38 : f32 to vector<16x64xf32>
    %122 = arith.mulf %121, %120 : vector<16x64xf32>
    %cst_39 = arith.constant 0.707106769 : f32
    %123 = vector.broadcast %cst_39 : f32 to vector<16x64xf32>
    %124 = arith.mulf %120, %123 : vector<16x64xf32>
    %125 = math.erf %124 : vector<16x64xf32>
    %cst_40 = arith.constant 1.000000e+00 : f32
    %126 = vector.broadcast %cst_40 : f32 to vector<16x64xf32>
    %127 = arith.addf %126, %125 : vector<16x64xf32>
    %128 = arith.mulf %122, %127 : vector<16x64xf32>
    %129 = arith.truncf %128 : vector<16x64xf32> to vector<16x64xbf16>
    %c0_41 = arith.constant 0 : index
    %c0_42 = arith.constant 0 : index
    %130 = vector.load %arg12[%c0_41, %c0_42] : memref<64x32xbf16, #tpu.memory_space<vmem>>, vector<64x32xbf16>
    %cst_43 = arith.constant dense<0.000000e+00> : vector<16x32xf32>
    %131 = tpu.matmul %129, %130, %cst_43 {dimension_numbers = #tpu.dot_dimension_numbers<[1], [0], [0], [1], [0, 0, 1, 1], [], []>} : vector<16x64xbf16>, vector<64x32xbf16>, vector<16x32xf32> -> vector<16x32xf32>
    %c0_44 = arith.constant 0 : index
    %c0_45 = arith.constant 0 : index
    %132 = vector.load %arg13[%c0_44, %c0_45] : memref<1x32xf32, #tpu.memory_space<vmem>>, vector<1x32xf32>
    %133 = vector.shape_cast %132 : vector<1x32xf32> to vector<32xf32>
    %134 = vector.shape_cast %133 : vector<32xf32> to vector<1x32xf32>
    %135 = vector.broadcast %134 : vector<1x32xf32> to vector<16x32xf32>
    %136 = arith.addf %131, %135 : vector<16x32xf32>
    %137 = arith.addf %84, %136 : vector<16x32xf32>
    %138 = vector.shape_cast %137 : vector<16x32xf32> to vector<2x8x32xf32>
    %c0_46 = arith.constant 0 : index
    %c0_47 = arith.constant 0 : index
    %c0_48 = arith.constant 0 : index
    %139 = vector.load %arg14[%c0_46, %c0_47, %c0_48] : memref<2x8x32xf32, #tpu.memory_space<vmem>>, vector<2x8x32xf32>
    tpu.vector_store %arg14[%c0_46, %c0_47, %c0_48], %138 {strides = array<i32>} : memref<2x8x32xf32, #tpu.memory_space<vmem>>, vector<2x8x32xf32>,
    return
  }
  func.func @transform_0(%arg0: i32) -> (i32, i32, i32) {
    %c0_i32 = arith.constant 0 : i32
    %c0_i32_0 = arith.constant 0 : i32
    %c0_i32_1 = arith.constant 0 : i32
    return %arg0, %c0_i32, %c0_i32_0 : i32, i32, i32
  }
  func.func @transform_1(%arg0: i32) -> (i32, i32) {
    %c0_i32 = arith.constant 0 : i32
    %c0_i32_0 = arith.constant 0 : i32
    %c0_i32_1 = arith.constant 0 : i32
    return %c0_i32, %c0_i32_0 : i32, i32
  }
  func.func @transform_2(%arg0: i32) -> (i32, i32) {
    %c0_i32 = arith.constant 0 : i32
    %c0_i32_0 = arith.constant 0 : i32
    %c0_i32_1 = arith.constant 0 : i32
    return %c0_i32, %c0_i32_0 : i32, i32
  }
  func.func @transform_3(%arg0: i32) -> (i32, i32) {
    %c0_i32 = arith.constant 0 : i32
    %c0_i32_0 = arith.constant 0 : i32
    %c0_i32_1 = arith.constant 0 : i32
    return %c0_i32, %c0_i32_0 : i32, i32
  }
  func.func @transform_4(%arg0: i32) -> (i32, i32) {
    %c0_i32 = arith.constant 0 : i32
    %c0_i32_0 = arith.constant 0 : i32
    %c0_i32_1 = arith.constant 0 : i32
    return %c0_i32, %c0_i32_0 : i32, i32
  }
  func.func @transform_5(%arg0: i32) -> (i32, i32) {
    %c0_i32 = arith.constant 0 : i32
    %c0_i32_0 = arith.constant 0 : i32
    %c0_i32_1 = arith.constant 0 : i32
    return %c0_i32, %c0_i32_0 : i32, i32
  }
  func.func @transform_6(%arg0: i32) -> (i32, i32) {
    %c0_i32 = arith.constant 0 : i32
    %c0_i32_0 = arith.constant 0 : i32
    %c0_i32_1 = arith.constant 0 : i32
    return %c0_i32, %c0_i32_0 : i32, i32
  }
  func.func @transform_7(%arg0: i32) -> (i32, i32) {
    %c0_i32 = arith.constant 0 : i32
    %c0_i32_0 = arith.constant 0 : i32
    %c0_i32_1 = arith.constant 0 : i32
    return %c0_i32, %c0_i32_0 : i32, i32
  }
  func.func @transform_8(%arg0: i32) -> (i32, i32) {
    %c0_i32 = arith.constant 0 : i32
    %c0_i32_0 = arith.constant 0 : i32
    %c0_i32_1 = arith.constant 0 : i32
    return %c0_i32, %c0_i32_0 : i32, i32
  }
  func.func @transform_9(%arg0: i32) -> (i32, i32) {
    %c0_i32 = arith.constant 0 : i32
    %c0_i32_0 = arith.constant 0 : i32
    %c0_i32_1 = arith.constant 0 : i32
    return %c0_i32, %c0_i32_0 : i32, i32
  }
  func.func @transform_10(%arg0: i32) -> (i32, i32) {
    %c0_i32 = arith.constant 0 : i32
    %c0_i32_0 = arith.constant 0 : i32
    %c0_i32_1 = arith.constant 0 : i32
    return %c0_i32, %c0_i32_0 : i32, i32
  }
  func.func @transform_11(%arg0: i32) -> (i32, i32) {
    %c0_i32 = arith.constant 0 : i32
    %c0_i32_0 = arith.constant 0 : i32
    %c0_i32_1 = arith.constant 0 : i32
    return %c0_i32, %c0_i32_0 : i32, i32
  }
  func.func @transform_12(%arg0: i32) -> (i32, i32) {
    %c0_i32 = arith.constant 0 : i32
    %c0_i32_0 = arith.constant 0 : i32
    %c0_i32_1 = arith.constant 0 : i32
    return %c0_i32, %c0_i32_0 : i32, i32
  }
  func.func @transform_13(%arg0: i32) -> (i32, i32, i32) {
    %c0_i32 = arith.constant 0 : i32
    %c0_i32_0 = arith.constant 0 : i32
    %c0_i32_1 = arith.constant 0 : i32
    return %arg0, %c0_i32, %c0_i32_0 : i32, i32, i32
  }
}

</mosaic_0001>

<bundles_post_ra>
// kernel: tpu_custom_call.1
= control target key start
LH: loop header
LB: loop body
LE: loop exit
PB: predicated region body
PF: predicated region fallthrough
CT: control target
= control target key end

     0   :  { %18 = vsyncpa [#allocation3], 0  ;;  %s2309_s0 = inlined_call_operand.vmem [shape: f32[2,8,32], index: 0, kind: input, shape index: {}]   ;;  %s2310_s1 = inlined_call_operand.vmem [shape: f32[1,32], index: 1, kind: input, shape index: {}]   ;;  %s2311_s2 = inlined_call_operand.vmem [shape: f32[1,32], index: 2, kind: input, shape index: {}]   ;;  %s2312_s3 = inlined_call_operand.vmem [shape: bf16[32,96], index: 3, kind: input, shape index: {}]   ;;  %s2313_s4 = inlined_call_operand.hbm [shape: f32[1,96], index: 4, kind: input, shape index: {}]   ;;  %s2314_s5 = inlined_call_operand.vmem [shape: bf16[32,32], index: 5, kind: input, shape index: {}]   ;;  %s2315_s6 = inlined_call_operand.hbm [shape: f32[1,32], index: 6, kind: input, shape index: {}]   ;;  %s2316_s7 = inlined_call_operand.hbm [shape: f32[1,32], index: 7, kind: input, shape index: {}]   ;;  %s2317_s8 = inlined_call_operand.hbm [shape: f32[1,32], index: 8, kind: input, shape index: {}]   ;;  %s2318_s9 = inlined_call_operand.vmem [shape: bf16[32,64], index: 9, kind: input, shape index: {}]   ;;  %s2319_s10 = inlined_call_operand.vmem [shape: f32[1,64], index: 10, kind: input, shape index: {}]   ;;  %s2320_s11 = inlined_call_operand.vmem [shape: bf16[64,32], index: 11, kind: input, shape index: {}]   ;;  %s2321_s12 = inlined_call_operand.vmem [shape: f32[1,32], index: 12, kind: input, shape index: {}]   ;;  %s2322_s13 = inlined_call_operand.hbm [shape: f32[2,8,32], index: 13, kind: output, shape index: {}]  }
   0x1   :  { %19 = vsyncpa [#allocation6], 0 }
   0x2   :  { %20 = vsyncpa [#allocation9], 0 }
   0x3   :  { %21 = vsyncpa [#allocation4], 0  ;;  %s1877_s25 = smov [#allocation5]   ;;  %s1878_s27 = smov [#allocation2]  }
   0x4   :  { %s48_s26 = sshll.u32 %s1877_s25, 4  ;;  %s36_s28 = sshll.u32 %s1878_s27, 4  ;;  %s49_s26 = int_to_ptr.vmem [resolvable:$true] %s48_s26  ;;  %s37_s28 = int_to_ptr.vmem [resolvable:$true] %s36_s28 }
   0x5   :  { %s1759_s14 = scalar_lea.hbm %s2315_s6, 16 }
   0x6   :  { %p1760_p0 = scmp.ne.s32.totalorder %s2315_s6, %s1759_s14  ;;  %p1763_p1 = scmp.lt.u32.totalorder %s1759_s14, %s2315_s6 }
   0x8   :  { %p1765_p2 = pnand %p1763_p1, %p1760_p0 }
   0xa   :  { %1768 = shalt.err (!%p1765_p2)
}
   0xb   :  { %s1769_s19 = scalar_lea.vmem %s49_s26, 16  ;;  %s1773_s20 = scalar_lea.vmem %s49_s26, 32 }
   0xc   :  { %p1770_p3 = scmp.ne.s32.totalorder %s49_s26, %s1769_s19  ;;  %p1774_p4 = scmp.lt.s32.totalorder %s49_s26, %s49_s26 }
   0xd   :  { %p1775_p5 = scmp.lt.s32.totalorder %s1773_s20, %s1769_s19 }
   0xf   :  { %p1776_p6 = por %p1775_p5, %p1774_p4 }
  0x11   :  { %p1777_p7 = pnand %p1776_p6, %p1770_p3 }
  0x13   :  { %1780 = shalt.err (!%p1777_p7)
}
  0x14   :  { %51 = dma.hbm_to_vmem [thread:$0]  %s2315_s6, 16, %s49_s26, [#allocation6]  }
  0x15   :  { %s1781_s25 = scalar_lea.hbm %s2313_s4, 16 }
  0x16   :  { %p1782_p8 = scmp.ne.s32.totalorder %s2313_s4, %s1781_s25  ;;  %p1785_p9 = scmp.lt.u32.totalorder %s1781_s25, %s2313_s4 }
  0x18   :  { %p1787_p10 = pnand %p1785_p9, %p1782_p8 }
  0x1a   :  { %1790 = shalt.err (!%p1787_p10)
}
  0x1b   :  { %s1791_s15 = scalar_lea.vmem %s37_s28, 16  ;;  %s1795_s16 = scalar_lea.vmem %s37_s28, 32 }
  0x1c   :  { %p1792_p11 = scmp.ne.s32.totalorder %s37_s28, %s1791_s15  ;;  %p1796_p12 = scmp.lt.s32.totalorder %s37_s28, %s37_s28 }
  0x1d   :  { %p1797_p13 = scmp.lt.s32.totalorder %s1795_s16, %s1791_s15 }
  0x1f   :  { %p1798_p0 = por %p1797_p13, %p1796_p12 }
  0x21   :  { %p1799_p1 = pnand %p1798_p0, %p1792_p11 }
  0x23   :  { %1802 = shalt.err (!%p1799_p1)
}
  0x24   :  { %39 = dma.hbm_to_vmem [thread:$0]  %s2313_s4, 16, %s37_s28, [#allocation3]  }
  0x25   :  { %s1879_s17 = smov [#allocation7]   ;;  %s1880_s19 = smov [#allocation8]  }
  0x26   :  { %s58_s18 = sshll.u32 %s1879_s17, 4  ;;  %s68_s20 = sshll.u32 %s1880_s19, 4  ;;  %s59_s18 = int_to_ptr.vmem [resolvable:$true] %s58_s18  ;;  %s69_s20 = int_to_ptr.vmem [resolvable:$true] %s68_s20 }
  0x27   :  { %s1803_s23 = scalar_lea.hbm %s2316_s7, 16 }
  0x28   :  { %p1804_p2 = scmp.ne.s32.totalorder %s2316_s7, %s1803_s23  ;;  %p1807_p3 = scmp.lt.u32.totalorder %s1803_s23, %s2316_s7 }
  0x2a   :  { %p1809_p4 = pnand %p1807_p3, %p1804_p2 }
  0x2c   :  { %1812 = shalt.err (!%p1809_p4)
}
  0x2d   :  { %s1813_s4 = scalar_lea.vmem %s59_s18, 16  ;;  %s1817_s28 = scalar_lea.vmem %s59_s18, 32 }
  0x2e   :  { %p1814_p5 = scmp.ne.s32.totalorder %s59_s18, %s1813_s4  ;;  %p1818_p6 = scmp.lt.s32.totalorder %s59_s18, %s59_s18 }
  0x2f   :  { %p1819_p7 = scmp.lt.s32.totalorder %s1817_s28, %s1813_s4 }
  0x31   :  { %p1820_p8 = por %p1819_p7, %p1818_p6 }
  0x33   :  { %p1821_p9 = pnand %p1820_p8, %p1814_p5 }
  0x35   :  { %1824 = shalt.err (!%p1821_p9)
}
  0x36   :  { %61 = dma.hbm_to_vmem [thread:$0]  %s2316_s7, 16, %s59_s18, [#allocation6]  }
  0x37   :  { %s1825_s6 = scalar_lea.hbm %s2317_s8, 16 }
  0x38   :  { %p1826_p10 = scmp.ne.s32.totalorder %s2317_s8, %s1825_s6  ;;  %p1829_p11 = scmp.lt.u32.totalorder %s1825_s6, %s2317_s8 }
  0x3a   :  { %p1831_p12 = pnand %p1829_p11, %p1826_p10 }
  0x3c   :  { %1834 = shalt.err (!%p1831_p12)
}
  0x3d   :  { %s1835_s22 = scalar_lea.vmem %s69_s20, 16  ;;  %s1839_s23 = scalar_lea.vmem %s69_s20, 32 }
  0x3e   :  { %p1836_p13 = scmp.ne.s32.totalorder %s69_s20, %s1835_s22  ;;  %p1840_p0 = scmp.lt.s32.totalorder %s69_s20, %s69_s20 }
  0x3f   :  { %p1841_p1 = scmp.lt.s32.totalorder %s1839_s23, %s1835_s22 }
  0x41   :  { %p1842_p2 = por %p1841_p1, %p1840_p0 }
  0x43   :  { %p1843_p3 = pnand %p1842_p2, %p1836_p13 }
  0x45   :  { %1846 = shalt.err (!%p1843_p3)
}
  0x46   :  { %71 = dma.hbm_to_vmem [thread:$0]  %s2317_s8, 16, %s69_s20, [#allocation9]  }
  0x47   :  { %1869 = dma.done.wait [#allocation3], 16  }
  0x48   :  { %1870 = vsyncadd [#allocation3], 4294967280 }
  0x49   :  { %1871 = dma.done.wait [#allocation6], 32  }
  0x4a   :  { %1872 = vsyncadd [#allocation6], 4294967264 }
  0x4b   :  { %1873 = dma.done.wait [#allocation9], 16  }
  0x4c   :  { %1874 = vsyncadd [#allocation9], 4294967280  ;;  %vm97_vm0 = vcmask 261120   ;;  %v2014_v0 = vld [vmem:[%s2309_s0] sm:$0xff]  ;;  %v2019_v1 = vld [vmem:[%s2309_s0 + $0x8] sm:$0xff]  ;;  %v1881_v15 = vmov 0.0  }
  0x4d   :  { %v98_v2 = vsel %vm97_vm0, %v2014_v0, 0.0  ;;  %v101_v3 = vsel %vm97_vm0, %v2019_v1, 0.0  ;;  %v1705_v14 = vld [vmem:[%s2312_s3] sm:$0xff]   ;;  %1527 = vmatprep.subr.bf16.mxu0 %v1881_v15  ;;  %1535 = vmatprep.subr.bf16.mxu1 %v1881_v15  ;;  %v1706_v16 = vld [vmem:[%s2312_s3 + $0x8] sm:$0xff]   ;;  %vm1882_vm1 = vmmov 0   ;;  %s1885_s15 = smov 104  }
  0x4e   :  { %99 = vadd.xlane.f32.xlu0 %v98_v2  ;;  %1528 = vmatpush3.bf16.msra.mxu0 %v1705_v14  ;;  %v1443_v25 = vld [vmem:[%s2310_s1] ss:$0 sm:$0xff]  ;;  %s1883_s1 = smov 112   ;;  %s1886_s16 = smov 96   ;;  %vm240_vm2 = vcmask 64512   ;;  %vm731_vm3 = vcmask 1043456  }
  0x4f   :  { %1531 = vmatprep.mubr.msk.bf16.mxu0 %vm1882_vm1, %v1881_v15  ;;  %1529 = vmatprep.subr.bf16.mxu0 %v1881_v15  ;;  %v1444_v29 = vld [vmem:[%s2311_s2] ss:$0 sm:$0xff]  ;;  %s1884_s2 = smov 120   ;;  %s1887_s6 = smov 64   ;;  %vm1137_vm4 = vcmask 130048   ;;  %vm1140_vm5 = vcmask 195584  }
  0x50   :  { %1537 = vmatprep.mubr.msk.bf16.mxu1 %vm1882_vm1, %v1881_v15  ;;  %v1445_v34 = vld [vmem:[#allocation2] ss:$0 sm:$0xff]  ;;  %s1888_s26 = smov 8   ;;  %s1889_s23 = smov 16   ;;  %vm1375_vm6 = vcmask 523264  }
  0x51   :  { %s1890_s7 = smov 24   ;;  %s1891_s14 = smov [#allocation10]  }
  0x52   :  { %102 = vadd.xlane.f32.xlu0 %v101_v3  ;;  %1530 = vmatpush3.bf16.msra.mxu0 %v1706_v16 }
  0x53   :  { %1541 = vmatprep.subr.bf16.mxu0 %v1881_v15 }
  0xdb   :  { %v100_v4 = vpop.xlane.xlu0 %99 }
  0xdc   :  { %v105_v5 = vmul.f32 0.03125, %v100_v4 }
  0xde   :  { %v107_v6 = vsub.f32 %v2014_v0, %v105_v5 }
  0xdf   :  { %v103_v7 = vpop.xlane.xlu0 %102 }
  0xe0   :  { %v106_v8 = vmul.f32 0.03125, %v103_v7  ;;  %v109_v9 = vmul.f32 %v107_v6, %v107_v6 }
  0xe2   :  { %v108_v10 = vsub.f32 %v2019_v1, %v106_v8  ;;  %v111_v11 = vsel %vm97_vm0, %v109_v9, 0.0 }
  0xe3   :  { %112 = vadd.xlane.f32.xlu1 %v111_v11 }
  0xe4   :  { %v110_v12 = vmul.f32 %v108_v10, %v108_v10 }
  0xe6   :  { %v114_v13 = vsel %vm97_vm0, %v110_v12, 0.0 }
  0xe7   :  { %115 = vadd.xlane.f32.xlu1 %v114_v13 }
 0x170   :  { %v113_v17 = vpop.xlane.xlu1 %112 }
 0x171   :  { %v117_v18 = vmul.f32 0.03125, %v113_v17 }
 0x173   :  { %v119_v19 = vadd.f32 1e-05, %v117_v18 }
 0x174   :  { %v116_v20 = vpop.xlane.xlu1 %115 }
 0x175   :  { %1715 = vrsqrt.f32 %v119_v19  ;;  %v118_v21 = vmul.f32 0.03125, %v116_v20 }
 0x177   :  { %v120_v22 = vadd.f32 1e-05, %v118_v21 }
 0x179   :  { %1717 = vrsqrt.f32 %v120_v22 }
 0x17f   :  { %v1716_v23 = vpop.eup %1715 }
 0x180   :  { %v123_v24 = vmul.f32 %v1716_v23, %v107_v6 }
 0x182   :  { %v131_v28 = vmul.f32 %v1443_v25, %v123_v24 }
 0x183   :  { %v1718_v26 = vpop.eup %1717 }
 0x184   :  { %v124_v27 = vmul.f32 %v1718_v26, %v108_v10  ;;  %v139_v31 = vadd.f32 %v1444_v29, %v131_v28 }
 0x186   :  { %v132_v30 = vmul.f32 %v1443_v25, %v124_v27 }
 0x188   :  { %v140_v32 = vadd.f32 %v1444_v29, %v132_v30 }
 0x18a   :  { %v141_v33 = vpack.c.bf16 %v140_v32, %v139_v31 }
 0x18c   :  { %1532 = vmatmul.mubr.msk.bf16.vlgmr.msra.gmra.mrb[0].mxu0 %vm97_vm0, %v141_v33 }
 0x18d   :  { %1543 = vmatprep.mubr.msk.bf16.mxu0 %vm1882_vm1, %v1881_v15 }
 0x25f   :  { %v202_v35 = vpop.f32.mrb[0].mxu0 }
 0x260   :  { %v1533_v36 = vpop.f32.mrb[1].mxu0  ;;  %v203_v38 = vadd.f32 %v1445_v34, %v202_v35 }
 0x261   :  { %v205_v37 = vpop.f32.mrb[2].mxu0 }
 0x262   :  { %v206_v39 = vadd.f32 %v1445_v34, %v205_v37  ;;  %v1534_v40 = vpop.f32.mrb[3].mxu0  ;;  %v229_v43 = vpack.c.bf16 %v203_v38, %v203_v38 }
 0x264   :  { %v1680_v41 = vpack.i.bf16 %v206_v39, %v203_v38  ;;  %v2052_v42 = vpack.c.bf16 %v206_v39, %v206_v39 }
 0x266   :  { %1681 = vrot.lane.b32.xlu1 %v1680_v41, %s1883_s1  ;;  %1676 = vrot.lane.b32.xlu0 %v1680_v41, %s1884_s2  ;;  %s1429_s1 = sshll.u32 %s1891_s14, 4  ;;  %s1430_s1 = int_to_ptr.vmem [resolvable:$true] %s1429_s1 }
 0x267   :  { %s1847_s2 = scalar_lea.vmem %s1430_s1, 256  ;;  %p1852_p5 = scmp.lt.s32.totalorder %s1430_s1, %s1430_s1 }
 0x268   :  { %p1848_p4 = scmp.ne.s32.totalorder %s1430_s1, %s1847_s2  ;;  %p1853_p6 = scmp.lt.s32.totalorder %s1847_s2, %s1847_s2 }
 0x26a   :  { %1686 = vrot.lane.b32.xlu1 %v1680_v41, %s1885_s15  ;;  %288 = vrot.lane.b32.xlu0 %v2052_v42, %s1886_s16  ;;  %p1854_p7 = por %p1853_p6, %p1852_p5 }
 0x26c   :  { %p1855_p8 = pnand %p1854_p7, %p1848_p4 }
 0x26e   :  { %238 = vrot.lane.b32.xlu1 %v229_v43, %s1886_s16 }
 0x2d8   :  { %v1682_v44 = vpop.permute.xlu1 %1681  ;;  %v1677_v45 = vpop.permute.xlu0 %1676 }
 0x2d9   :  { %v1679_v46 = vunpack.i.h.bf16 %v1677_v45  ;;  %v1678_v47 = vunpack.i.l.bf16 %v1677_v45  ;;  %v1684_v48 = vunpack.i.h.bf16 %v1682_v44  ;;  %v1683_v49 = vunpack.i.l.bf16 %v1682_v44 }
 0x2db   :  { %v2057_v50 = vpack.c.bf16 %v1679_v46, %v1679_v46  ;;  %v2059_v51 = vpack.c.bf16 %v1678_v47, %v1678_v47  ;;  %v2066_v55 = vpack.c.bf16 %v1684_v48, %v1684_v48  ;;  %v2068_v56 = vpack.c.bf16 %v1683_v49, %v1683_v49 }
 0x2dc   :  { %v1687_v52 = vpop.permute.xlu1 %1686  ;;  %v289_v53 = vpop.permute.xlu0 %288 }
 0x2dd   :  { %v294_v54 = vsel %vm240_vm2, %v289_v53, 0  ;;  %337 = vrot.lane.b32.xlu1 %v2059_v51, %s1886_s16  ;;  %386 = vrot.lane.b32.xlu0 %v2057_v50, %s1886_s16  ;;  %v1689_v57 = vunpack.i.h.bf16 %v1687_v52  ;;  %v1688_v58 = vunpack.i.l.bf16 %v1687_v52 }
 0x2de   :  { %1542 = vmatpush3.bf16.xpose.msra.mxu0 %v294_v54 }
 0x2df   :  { %1553 = vmatprep.subr.bf16.mxu0 %v1881_v15  ;;  %v2076_v61 = vpack.c.bf16 %v1689_v57, %v1689_v57  ;;  %v2078_v62 = vpack.c.bf16 %v1688_v58, %v1688_v58 }
 0x2e0   :  { %v239_v59 = vpop.permute.xlu1 %238 }
 0x2e1   :  { %435 = vrot.lane.b32.xlu1 %v2068_v56, %s1886_s16  ;;  %484 = vrot.lane.b32.xlu0 %v2066_v55, %s1886_s16  ;;  %v245_v60 = vsel %vm240_vm2, %v239_v59, 0 }
 0x2e2   :  { %1536 = vmatpush3.bf16.xpose.msra.mxu1 %v245_v60 }
 0x2e3   :  { %1547 = vmatprep.subr.bf16.mxu1 %v1881_v15 }
 0x2e5   :  { %533 = vrot.lane.b32.xlu1 %v2078_v62, %s1886_s16  ;;  %582 = vrot.lane.b32.xlu0 %v2076_v61, %s1886_s16 }
 0x2e6   :  { %1544 = vmatmul.mubr.msk.bf16.vlgmr.msra.gmra.mrb[4].mxu0 %vm240_vm2, %v2052_v42 }
 0x2e7   :  { %1555 = vmatprep.mubr.msk.bf16.mxu0 %vm1882_vm1, %v1881_v15 }
 0x2e9   :  { %1538 = vmatmul.mubr.msk.bf16.vlgmr.msra.gmra.mrb[0].mxu1 %vm240_vm2, %v229_v43  ;;  %726 = vrot.lane.b32.xlu1 %v229_v43, %s1887_s6 }
 0x2ea   :  { %1549 = vmatprep.mubr.msk.bf16.mxu1 %vm1882_vm1, %v1881_v15 }
 0x34f   :  { %v338_v63 = vpop.permute.xlu1 %337  ;;  %v387_v2 = vpop.permute.xlu0 %386 }
 0x350   :  { %v343_v3 = vsel %vm240_vm2, %v338_v63, 0  ;;  %v392_v4 = vsel %vm240_vm2, %v387_v2, 0 }
 0x351   :  { %1548 = vmatpush3.bf16.xpose.msra.mxu1 %v343_v3  ;;  %1554 = vmatpush3.bf16.xpose.msra.mxu0 %v392_v4 }
 0x352   :  { %1559 = vmatprep.subr.bf16.mxu1 %v1881_v15  ;;  %1565 = vmatprep.subr.bf16.mxu0 %v1881_v15 }
 0x353   :  { %v436_v5 = vpop.permute.xlu1 %435  ;;  %v485_v6 = vpop.permute.xlu0 %484 }
 0x354   :  { %v441_v7 = vsel %vm240_vm2, %v436_v5, 0  ;;  %v490_v8 = vsel %vm240_vm2, %v485_v6, 0 }
 0x357   :  { %v534_v9 = vpop.permute.xlu1 %533  ;;  %v583_v10 = vpop.permute.xlu0 %582 }
 0x358   :  { %1550 = vmatmul.mubr.msk.bf16.vlgmr.msra.gmra.mrb[4].mxu1 %vm240_vm2, %v2059_v51  ;;  %1556 = vmatmul.mubr.msk.bf16.vlgmr.msra.gmra.mrb[8].mxu0 %vm240_vm2, %v2057_v50  ;;  %v539_v11 = vsel %vm240_vm2, %v534_v9, 0  ;;  %v588_v12 = vsel %vm240_vm2, %v583_v10, 0 }
 0x359   :  { %1560 = vmatpush3.bf16.xpose.msra.mxu1 %v441_v7  ;;  %1566 = vmatpush3.bf16.xpose.msra.mxu0 %v490_v8 }
 0x35a   :  { %1561 = vmatprep.mubr.msk.bf16.mxu1 %vm1882_vm1, %v1881_v15  ;;  %1567 = vmatprep.mubr.msk.bf16.mxu0 %vm1882_vm1, %v1881_v15 }
 0x35b   :  { %1571 = vmatprep.subr.bf16.mxu1 %v1881_v15  ;;  %1577 = vmatprep.subr.bf16.mxu0 %v1881_v15  ;;  %v727_v13 = vpop.permute.xlu1 %726 }
 0x35c   :  { %v733_v14 = vsel %vm731_vm3, %v727_v13, 0 }
 0x360   :  { %1562 = vmatmul.mubr.msk.bf16.vlgmr.msra.gmra.mrb[8].mxu1 %vm240_vm2, %v2068_v56  ;;  %1568 = vmatmul.mubr.msk.bf16.vlgmr.msra.gmra.mrb[12].mxu0 %vm240_vm2, %v2066_v55 }
 0x361   :  { %1572 = vmatpush3.bf16.xpose.msra.mxu1 %v539_v11  ;;  %1578 = vmatpush3.bf16.xpose.msra.mxu0 %v588_v12 }
 0x362   :  { %1573 = vmatprep.mubr.msk.bf16.mxu1 %vm1882_vm1, %v1881_v15  ;;  %1579 = vmatprep.mubr.msk.bf16.mxu0 %vm1882_vm1, %v1881_v15 }
 0x363   :  { %1583 = vmatprep.subr.bf16.mxu1 %v1881_v15  ;;  %1589 = vmatprep.subr.bf16.mxu0 %v1881_v15 }
 0x368   :  { %1574 = vmatmul.mubr.msk.bf16.vlgmr.msra.gmra.mrb[12].mxu1 %vm240_vm2, %v2078_v62  ;;  %1580 = vmatmul.mubr.msk.bf16.vlgmr.msra.gmra.mrb[16].mxu0 %vm240_vm2, %v2076_v61 }
 0x369   :  { %1584 = vmatpush3.bf16.msra.mxu1 %v733_v14  ;;  %1591 = vmatprep.mubr.msk.bf16.mxu0 %vm1882_vm1, %v1881_v15 }
 0x36a   :  { %1585 = vmatprep.mubr.msk.bf16.mxu1 %vm1882_vm1, %v1881_v15  ;;  %1595 = vmatprep.subr.bf16.mxu1 %v1881_v15 }
 0x3b9   :  { %v330_v16 = vpop.f32.mrb[4].mxu0 }
 0x3ba   :  { %v1545_v17 = vpop.f32.mrb[5].mxu0  ;;  %v633_v18 = vsel %vm240_vm2, %v330_v16, -inf }
 0x3bb   :  { %634 = vmax.xlane.f32.xlu0 %v633_v18  ;;  %v333_v19 = vpop.f32.mrb[6].mxu0 }
 0x3bc   :  { %v1546_v20 = vpop.f32.mrb[7].mxu0  ;;  %v281_v21 = vpop.f32.mrb[0].mxu1 }
 0x3bd   :  { %v1539_v22 = vpop.f32.mrb[1].mxu1  ;;  %v630_v23 = vsel %vm240_vm2, %v281_v21, -inf }
 0x3be   :  { %v284_v24 = vpop.f32.mrb[2].mxu1  ;;  %631 = vmax.xlane.f32.xlu1 %v630_v23 }
 0x3bf   :  { %v1540_v25 = vpop.f32.mrb[3].mxu1 }
 0x42b   :  { %v379_v26 = vpop.f32.mrb[4].mxu1  ;;  %v428_v27 = vpop.f32.mrb[8].mxu0 }
 0x42c   :  { %v1551_v28 = vpop.f32.mrb[5].mxu1  ;;  %v1557_v29 = vpop.f32.mrb[9].mxu0  ;;  %v636_v30 = vsel %vm240_vm2, %v379_v26, -inf  ;;  %v639_v35 = vsel %vm240_vm2, %v428_v27, -inf }
 0x42d   :  { %v382_v31 = vpop.f32.mrb[6].mxu1  ;;  %637 = vmax.xlane.f32.xlu0 %v636_v30  ;;  %v431_v32 = vpop.f32.mrb[10].mxu0 }
 0x42e   :  { %v1552_v33 = vpop.f32.mrb[7].mxu1  ;;  %v1558_v34 = vpop.f32.mrb[11].mxu0 }
 0x431   :  { %640 = vmax.xlane.f32.xlu0 %v639_v35 }
 0x433   :  { %v477_v36 = vpop.f32.mrb[8].mxu1  ;;  %v2135_v37 = vpop.f32.mrb[12].mxu0 }
 0x434   :  { %v1563_v38 = vpop.f32.mrb[9].mxu1  ;;  %v1569_v39 = vpop.f32.mrb[13].mxu0  ;;  %v642_v40 = vsel %vm240_vm2, %v477_v36, -inf  ;;  %v645_v41 = vsel %vm240_vm2, %v2135_v37, -inf }
 0x435   :  { %643 = vmax.xlane.f32.xlu1 %v642_v40  ;;  %v480_v43 = vpop.f32.mrb[10].mxu1  ;;  %646 = vmax.xlane.f32.xlu0 %v645_v41  ;;  %v529_v44 = vpop.f32.mrb[14].mxu0 }
 0x436   :  { %v1564_v45 = vpop.f32.mrb[11].mxu1  ;;  %v1570_v46 = vpop.f32.mrb[15].mxu0 }
 0x43b   :  { %v575_v47 = vpop.f32.mrb[12].mxu1  ;;  %v2140_v48 = vpop.f32.mrb[16].mxu0 }
 0x43c   :  { %v1575_v49 = vpop.f32.mrb[13].mxu1  ;;  %v1581_v52 = vpop.f32.mrb[17].mxu0  ;;  %v648_v53 = vsel %vm240_vm2, %v575_v47, -inf  ;;  %v651_v54 = vsel %vm240_vm2, %v2140_v48, -inf }
 0x43d   :  { %649 = vmax.xlane.f32.xlu1 %v648_v53  ;;  %v578_v57 = vpop.f32.mrb[14].mxu1  ;;  %652 = vmax.xlane.f32.xlu0 %v651_v54  ;;  %v627_v58 = vpop.f32.mrb[18].mxu0 }
 0x43e   :  { %v1576_v59 = vpop.f32.mrb[15].mxu1  ;;  %v1582_v60 = vpop.f32.mrb[19].mxu0 }
 0x448   :  { %v635_v63 = vpop.xlane.xlu0 %634 }
 0x449   :  { %v655_v2 = vsub.f32 %v330_v16, %v635_v63 }
 0x44b   :  { %v632_v3 = vpop.xlane.xlu1 %631  ;;  %v664_v4 = vmul.f32 1.442695, %v655_v2 }
 0x44c   :  { %v654_v5 = vsub.f32 %v281_v21, %v632_v3 }
 0x44d   :  { %1719 = vpow2.f32 %v664_v4 }
 0x44e   :  { %823 = vrot.lane.b32.xlu1 %v2059_v51, %s1887_s6  ;;  %v662_v6 = vmul.f32 1.442695, %v654_v5 }
 0x450   :  { %1721 = vpow2.f32 %v662_v6 }
 0x452   :  { %871 = vrot.lane.b32.xlu1 %v2057_v50, %s1887_s6 }
 0x453   :  { %775 = vrot.lane.b32.xlu0 %v2052_v42, %s1887_s6 }
 0x457   :  { %v1720_v7 = vpop.eup %1719 }
 0x458   :  { %v681_v8 = vsel %vm240_vm2, %v1720_v7, 0.0 }
 0x45a   :  { %v2152_v9 = vpop.eup %1721 }
 0x45b   :  { %v678_v50 = vsel %vm240_vm2, %v2152_v9, 0.0 }
 0x472   :  { %682 = vadd.xlane.f32.xlu0 %v681_v8 }
 0x476   :  { %679 = vadd.xlane.f32.xlu1 %v678_v50 }
 0x487   :  { %919 = vrot.lane.b32.xlu1 %v2068_v56, %s1887_s6 }
 0x4ba   :  { %v638_v42 = vpop.xlane.xlu0 %637 }
 0x4bb   :  { %v656_v51 = vsub.f32 %v379_v26, %v638_v42 }
 0x4bd   :  { %v666_v10 = vmul.f32 1.442695, %v656_v51 }
 0x4be   :  { %v641_v11 = vpop.xlane.xlu0 %640 }
 0x4bf   :  { %1723 = vpow2.f32 %v666_v10  ;;  %v657_v12 = vsub.f32 %v428_v27, %v641_v11 }
 0x4c1   :  { %v668_v13 = vmul.f32 1.442695, %v657_v12 }
 0x4c2   :  { %v644_v14 = vpop.xlane.xlu1 %643  ;;  %v647_v18 = vpop.xlane.xlu0 %646 }
 0x4c3   :  { %1725 = vpow2.f32 %v668_v13  ;;  %v658_v16 = vsub.f32 %v477_v36, %v644_v14  ;;  %v659_v32 = vsub.f32 %v2135_v37, %v647_v18 }
 0x4c5   :  { %v670_v17 = vmul.f32 1.442695, %v658_v16  ;;  %v672_v33 = vmul.f32 1.442695, %v659_v32 }
 0x4c7   :  { %1727 = vpow2.f32 %v670_v17 }
 0x4c9   :  { %v2158_v19 = vpop.eup %1723 }
 0x4ca   :  { %v650_v20 = vpop.xlane.xlu1 %649  ;;  %v653_v21 = vpop.xlane.xlu0 %652  ;;  %v684_v56 = vsel %vm240_vm2, %v2158_v19, 0.0 }
 0x4cb   :  { %v660_v22 = vsub.f32 %v575_v47, %v650_v20  ;;  %685 = vadd.xlane.f32.xlu1 %v684_v56  ;;  %v661_v34 = vsub.f32 %v2140_v48, %v653_v21 }
 0x4cd   :  { %v2162_v23 = vpop.eup %1725  ;;  %v674_v24 = vmul.f32 1.442695, %v660_v22  ;;  %v676_v35 = vmul.f32 1.442695, %v661_v34 }
 0x4ce   :  { %v776_v25 = vpop.permute.xlu0 %775  ;;  %v687_v26 = vsel %vm240_vm2, %v2162_v23, 0.0  ;;  %v824_v36 = vpop.permute.xlu1 %823 }
 0x4cf   :  { %1729 = vpow2.f32 %v674_v24  ;;  %v781_v27 = vsel %vm731_vm3, %v776_v25, 0  ;;  %688 = vadd.xlane.f32.xlu0 %v687_v26  ;;  %v829_v52 = vsel %vm731_vm3, %v824_v36, 0 }
 0x4d0   :  { %1590 = vmatpush3.bf16.msra.mxu0 %v781_v27  ;;  %1731 = vpow2.f32 %v672_v33 }
 0x4d1   :  { %v2167_v28 = vpop.eup %1727  ;;  %1601 = vmatprep.subr.bf16.mxu0 %v1881_v15  ;;  %1733 = vpow2.f32 %v676_v35 }
 0x4d2   :  { %v690_v29 = vsel %vm240_vm2, %v2167_v28, 0.0  ;;  %v872_v38 = vpop.permute.xlu1 %871 }
 0x4d3   :  { %691 = vadd.xlane.f32.xlu1 %v690_v29  ;;  %v877_v47 = vsel %vm731_vm3, %v872_v38, 0 }
 0x4d9   :  { %v2172_v30 = vpop.eup %1729 }
 0x4da   :  { %v696_v31 = vsel %vm240_vm2, %v2172_v30, 0.0  ;;  %v2182_v40 = vpop.eup %1731 }
 0x4db   :  { %697 = vadd.xlane.f32.xlu1 %v696_v31  ;;  %v2186_v43 = vpop.eup %1733 }
 0x4e5   :  { %967 = vrot.lane.b32.xlu0 %v2066_v55, %s1887_s6  ;;  %v693_v55 = vsel %vm240_vm2, %v2182_v40, 0.0 }
 0x4ec   :  { %1015 = vrot.lane.b32.xlu1 %v2078_v62, %s1887_s6  ;;  %v699_v62 = vsel %vm240_vm2, %v2186_v43, 0.0 }
 0x4ff   :  { %v683_v39 = vpop.xlane.xlu0 %682 }
 0x500   :  { %1735 = vrcp.f32 %v683_v39 }
 0x503   :  { %v680_v41 = vpop.xlane.xlu1 %679 }
 0x504   :  { %1737 = vrcp.f32 %v680_v41  ;;  %694 = vadd.xlane.f32.xlu0 %v693_v55 }
 0x507   :  { %v920_v53 = vpop.permute.xlu1 %919 }
 0x508   :  { %700 = vadd.xlane.f32.xlu0 %v699_v62  ;;  %v925_v3 = vsel %vm731_vm3, %v920_v53, 0 }
 0x50a   :  { %v1736_v37 = vpop.eup %1735 }
 0x50b   :  { %v711_v44 = vmul.f32 %v1736_v37, %v1720_v7 }
 0x50d   :  { %v719_v45 = vpack.c.bf16 %v711_v44, %v711_v44 }
 0x50e   :  { %v1738_v46 = vpop.eup %1737 }
 0x50f   :  { %v710_v48 = vmul.f32 %v1738_v46, %v2152_v9  ;;  %1592 = vmatmul.mubr.msk.bf16.vlgmr.msra.gmra.mrb[20].mxu0 %vm240_vm2, %v719_v45 }
 0x510   :  { %1602 = vmatpush3.bf16.msra.mxu0 %v877_v47  ;;  %1603 = vmatprep.mubr.msk.bf16.mxu0 %vm1882_vm1, %v1881_v15  ;;  %v1707_v47 = vld [vmem:[%s2314_s5] sm:$0xff]  }
 0x511   :  { %v718_v49 = vpack.c.bf16 %v710_v48, %v710_v48  ;;  %1613 = vmatprep.subr.bf16.mxu0 %v1881_v15  ;;  %v1708_v48 = vld [vmem:[%s2314_s5 + $0x8] sm:$0xff]  }
 0x513   :  { %1586 = vmatmul.mubr.msk.bf16.vlgmr.msra.gmra.mrb[16].mxu1 %vm240_vm2, %v718_v49 }
 0x514   :  { %1596 = vmatpush3.bf16.msra.mxu1 %v829_v52  ;;  %1597 = vmatprep.mubr.msk.bf16.mxu1 %vm1882_vm1, %v1881_v15 }
 0x515   :  { %1607 = vmatprep.subr.bf16.mxu1 %v1881_v15 }
 0x51e   :  { %1063 = vrot.lane.b32.xlu0 %v2076_v61, %s1887_s6 }
 0x558   :  { %v686_v54 = vpop.xlane.xlu1 %685 }
 0x559   :  { %1739 = vrcp.f32 %v686_v54 }
 0x55c   :  { %v689_v57 = vpop.xlane.xlu0 %688 }
 0x55d   :  { %1741 = vrcp.f32 %v689_v57 }
 0x560   :  { %v692_v58 = vpop.xlane.xlu1 %691  ;;  %v968_v61 = vpop.permute.xlu0 %967 }
 0x561   :  { %1743 = vrcp.f32 %v692_v58  ;;  %v973_v9 = vsel %vm731_vm3, %v968_v61, 0 }
 0x563   :  { %v1740_v59 = vpop.eup %1739 }
 0x564   :  { %v712_v60 = vmul.f32 %v1740_v59, %v2158_v19 }
 0x566   :  { %v720_v63 = vpack.c.bf16 %v712_v60, %v712_v60 }
 0x567   :  { %v1742_v2 = vpop.eup %1741 }
 0x568   :  { %v713_v4 = vmul.f32 %v1742_v2, %v2162_v23  ;;  %1598 = vmatmul.mubr.msk.bf16.vlgmr.msra.gmra.mrb[20].mxu1 %vm240_vm2, %v720_v63  ;;  %v698_v5 = vpop.xlane.xlu1 %697 }
 0x569   :  { %1608 = vmatpush3.bf16.msra.mxu1 %v925_v3  ;;  %1745 = vrcp.f32 %v698_v5  ;;  %1609 = vmatprep.mubr.msk.bf16.mxu1 %vm1882_vm1, %v1881_v15 }
 0x56a   :  { %v721_v6 = vpack.c.bf16 %v713_v4, %v713_v4  ;;  %1619 = vmatprep.subr.bf16.mxu1 %v1881_v15 }
 0x56b   :  { %v1744_v7 = vpop.eup %1743 }
 0x56c   :  { %v714_v8 = vmul.f32 %v1744_v7, %v2167_v28  ;;  %1604 = vmatmul.mubr.msk.bf16.vlgmr.msra.gmra.mrb[24].mxu0 %vm240_vm2, %v721_v6  ;;  %v1016_v50 = vpop.permute.xlu1 %1015 }
 0x56d   :  { %1614 = vmatpush3.bf16.msra.mxu0 %v973_v9  ;;  %1615 = vmatprep.mubr.msk.bf16.mxu0 %vm1882_vm1, %v1881_v15  ;;  %v1021_v51 = vsel %vm731_vm3, %v1016_v50, 0 }
 0x56e   :  { %v722_v42 = vpack.c.bf16 %v714_v8, %v714_v8  ;;  %1625 = vmatprep.subr.bf16.mxu0 %v1881_v15 }
 0x570   :  { %1610 = vmatmul.mubr.msk.bf16.vlgmr.msra.gmra.mrb[24].mxu1 %vm240_vm2, %v722_v42 }
 0x571   :  { %1620 = vmatpush3.bf16.msra.mxu1 %v1021_v51  ;;  %1621 = vmatprep.mubr.msk.bf16.mxu1 %vm1882_vm1, %v1881_v15 }
 0x572   :  { %1631 = vmatprep.subr.bf16.mxu1 %v1881_v15 }
 0x573   :  { %v1746_v10 = vpop.eup %1745 }
 0x574   :  { %v716_v11 = vmul.f32 %v1746_v10, %v2172_v30 }
 0x576   :  { %v724_v12 = vpack.c.bf16 %v716_v11, %v716_v11 }
 0x578   :  { %1622 = vmatmul.mubr.msk.bf16.vlgmr.msra.gmra.mrb[28].mxu1 %vm240_vm2, %v724_v12 }
 0x579   :  { %1635 = vmatprep.mubr.msk.bf16.mxu1 %vm1882_vm1, %v1881_v15  ;;  %1632 = vmatpush3.bf16.msra.mxu1 %v1707_v47  ;;  %v1470_v47 = vld [vmem:[#allocation8] ss:$0 sm:$0xff] }
 0x57a   :  { %1633 = vmatprep.subr.bf16.mxu1 %v1881_v15 }
 0x57d   :  { %1634 = vmatpush3.bf16.msra.mxu1 %v1708_v48 }
 0x57e   :  { %1647 = vmatprep.subr.bf16.mxu1 %v1881_v15 }
 0x591   :  { %v695_v13 = vpop.xlane.xlu0 %694 }
 0x592   :  { %1747 = vrcp.f32 %v695_v13 }
 0x595   :  { %v701_v14 = vpop.xlane.xlu0 %700 }
 0x596   :  { %1749 = vrcp.f32 %v701_v14 }
 0x599   :  { %v1064_v18 = vpop.permute.xlu0 %1063 }
 0x59a   :  { %v1069_v21 = vsel %vm731_vm3, %v1064_v18, 0 }
 0x59c   :  { %v1748_v16 = vpop.eup %1747 }
 0x59d   :  { %v715_v17 = vmul.f32 %v1748_v16, %v2182_v40  ;;  %v1465_v16 = vld [vmem:[#allocation5] ss:$0 sm:$0xff] }
 0x59f   :  { %v723_v19 = vpack.c.bf16 %v715_v17, %v715_v17 }
 0x5a0   :  { %v1750_v20 = vpop.eup %1749 }
 0x5a1   :  { %1616 = vmatmul.mubr.msk.bf16.vlgmr.msra.gmra.mrb[28].mxu0 %vm240_vm2, %v723_v19  ;;  %v717_v56 = vmul.f32 %v1750_v20, %v2186_v43 }
 0x5a2   :  { %1626 = vmatpush3.bf16.msra.mxu0 %v1069_v21  ;;  %1627 = vmatprep.mubr.msk.bf16.mxu0 %vm1882_vm1, %v1881_v15 }
 0x5a3   :  { %1639 = vmatprep.subr.bf16.mxu0 %v1881_v15  ;;  %v725_v22 = vpack.c.bf16 %v717_v56, %v717_v56 }
 0x5a9   :  { %1628 = vmatmul.mubr.msk.bf16.vlgmr.msra.gmra.mrb[32].mxu0 %vm240_vm2, %v725_v22 }
 0x5aa   :  { %1643 = vmatprep.mubr.msk.bf16.mxu0 %vm1882_vm1, %v1881_v15 }
 0x5e2   :  { %v817_v23 = vpop.f32.mrb[20].mxu0 }
 0x5e3   :  { %v1593_v24 = vpop.f32.mrb[21].mxu0 }
 0x5e4   :  { %v820_v25 = vpop.f32.mrb[22].mxu0 }
 0x5e5   :  { %v1594_v26 = vpop.f32.mrb[23].mxu0 }
 0x5e6   :  { %v769_v27 = vpop.f32.mrb[16].mxu1 }
 0x5e7   :  { %v1587_v28 = vpop.f32.mrb[17].mxu1 }
 0x5e8   :  { %v772_v29 = vpop.f32.mrb[18].mxu1 }
 0x5e9   :  { %v1588_v30 = vpop.f32.mrb[19].mxu1 }
 0x63b   :  { %v865_v31 = vpop.f32.mrb[20].mxu1 }
 0x63c   :  { %v1599_v32 = vpop.f32.mrb[21].mxu1 }
 0x63d   :  { %v868_v33 = vpop.f32.mrb[22].mxu1 }
 0x63e   :  { %v1600_v34 = vpop.f32.mrb[23].mxu1 }
 0x63f   :  { %v913_v35 = vpop.f32.mrb[24].mxu0  ;;  %v1709_v34 = vld [vmem:[%s2318_s9] sm:$0xff]  }
 0x640   :  { %v1690_v36 = vpack.i.bf16 %v913_v35, %v865_v31  ;;  %v1605_v38 = vpop.f32.mrb[25].mxu0  ;;  %1640 = vmatpush3.bf16.msra.mxu0 %v1709_v34  ;;  %v1710_v35 = vld [vmem:[%s2318_s9 + $0x8] sm:$0xff]  }
 0x641   :  { %v916_v39 = vpop.f32.mrb[26].mxu0  ;;  %1641 = vmatprep.subr.bf16.mxu0 %v1881_v15 }
 0x642   :  { %1691 = vrot.lane.b32.xlu1 %v1690_v36, %s1888_s26  ;;  %v1606_v40 = vpop.f32.mrb[27].mxu0 }
 0x643   :  { %v961_v41 = vpop.f32.mrb[24].mxu1 }
 0x644   :  { %v1611_v55 = vpop.f32.mrb[25].mxu1  ;;  %1642 = vmatpush3.bf16.msra.mxu0 %v1710_v35 }
 0x645   :  { %v964_v43 = vpop.f32.mrb[26].mxu1 }
 0x646   :  { %v1612_v62 = vpop.f32.mrb[27].mxu1 }
 0x64b   :  { %v1057_v37 = vpop.f32.mrb[28].mxu1 }
 0x64c   :  { %v1623_v44 = vpop.f32.mrb[29].mxu1 }
 0x64d   :  { %v1060_v45 = vpop.f32.mrb[30].mxu1 }
 0x64e   :  { %v1624_v46 = vpop.f32.mrb[31].mxu1 }
 0x674   :  { %v1009_v49 = vpop.f32.mrb[28].mxu0 }
 0x675   :  { %v1695_v52 = vpack.i.bf16 %v1009_v49, %v961_v41  ;;  %v1617_v53 = vpop.f32.mrb[29].mxu0 }
 0x676   :  { %v1012_v54 = vpop.f32.mrb[30].mxu0 }
 0x677   :  { %1696 = vrot.lane.b32.xlu0 %v1695_v52, %s1889_s23  ;;  %v1618_v57 = vpop.f32.mrb[31].mxu0  ;;  %v1711_v54 = vld [vmem:[%s2320_s11] sm:$0xff]  }
 0x678   :  { %v1712_v57 = vld [vmem:[%s2320_s11 + $0x8] sm:$0xff]  }
 0x67c   :  { %v1105_v58 = vpop.f32.mrb[32].mxu0 }
 0x67d   :  { %v1700_v59 = vpack.i.bf16 %v1105_v58, %v1057_v37  ;;  %v1629_v60 = vpop.f32.mrb[33].mxu0  ;;  %v1469_v37 = vld [vmem:[#allocation7] ss:$0 sm:$0xff]  ;;  %v1713_v58 = vld [vmem:[%s2320_s11 + $0x10] sm:$0xff]  }
 0x67e   :  { %v1108_v63 = vpop.f32.mrb[34].mxu0  ;;  %v1471_v60 = vld [vmem:[%s2319_s10] ss:$0 sm:$0xff] }
 0x67f   :  { %1701 = vrot.lane.b32.xlu1 %v1700_v59, %s1890_s7  ;;  %v1630_v2 = vpop.f32.mrb[35].mxu0  ;;  %v1714_v59 = vld [vmem:[%s2320_s11 + $0x18] sm:$0xff]  }
 0x6b4   :  { %v1692_v3 = vpop.permute.xlu1 %1691 }
 0x6b5   :  { %v1694_v5 = vunpack.i.h.bf16 %v1692_v3  ;;  %v1693_v61 = vunpack.i.l.bf16 %v1692_v3 }
 0x6b7   :  { %v1136_v9 = vsel %vm240_vm2, %v817_v23, %v1694_v5  ;;  %v1135_v50 = vsel %vm240_vm2, %v769_v27, %v1693_v61 }
 0x6e9   :  { %v1697_v4 = vpop.permute.xlu0 %1696 }
 0x6ea   :  { %v1699_v6 = vunpack.i.h.bf16 %v1697_v4  ;;  %v1698_v7 = vunpack.i.l.bf16 %v1697_v4 }
 0x6ec   :  { %v1139_v10 = vsel %vm1137_vm4, %v1136_v9, %v1699_v6  ;;  %v1138_v11 = vsel %vm1137_vm4, %v1135_v50, %v1698_v7 }
 0x6f1   :  { %v1702_v8 = vpop.permute.xlu1 %1701 }
 0x6f2   :  { %v1704_v42 = vunpack.i.h.bf16 %v1702_v8  ;;  %v1703_v51 = vunpack.i.l.bf16 %v1702_v8 }
 0x6f4   :  { %v1142_v12 = vsel %vm1140_vm5, %v1139_v10, %v1704_v42  ;;  %v1141_v13 = vsel %vm1140_vm5, %v1138_v11, %v1703_v51 }
 0x6f5   :  { %v1143_v14 = vpack.c.bf16 %v1142_v12, %v1141_v13  ;;  %v1475_v13 = vld [vmem:[%s2321_s12] ss:$0 sm:$0xff] }
 0x6f7   :  { %1636 = vmatmul.mubr.msk.bf16.vlgmr.msra.gmra.mrb[32].mxu1 %vm97_vm0, %v1143_v14 }
 0x6f8   :  { %1655 = vmatprep.mubr.msk.bf16.mxu1 %vm1882_vm1, %v1881_v15  ;;  %1648 = vmatpush3.bf16.msra.mxu1 %v1711_v54 }
 0x6f9   :  { %1649 = vmatprep.subr.bf16.mxu1 %v1881_v15 }
 0x6fc   :  { %1650 = vmatpush3.bf16.msra.mxu1 %v1712_v57 }
 0x6fd   :  { %1651 = vmatprep.subr.bf16.mxu1 %v1881_v15 }
 0x700   :  { %1652 = vmatpush3.bf16.msra.mxu1 %v1713_v58 }
 0x701   :  { %1653 = vmatprep.subr.bf16.mxu1 %v1881_v15 }
 0x704   :  { %1654 = vmatpush3.bf16.msra.mxu1 %v1714_v59 }
 0x7ca   :  { %v1204_v17 = vpop.f32.mrb[32].mxu1 }
 0x7cb   :  { %v1205_v18 = vadd.f32 %v1465_v16, %v1204_v17  ;;  %v1637_v19 = vpop.f32.mrb[33].mxu1 }
 0x7cc   :  { %v1207_v20 = vpop.f32.mrb[34].mxu1 }
 0x7cd   :  { %v2250_v21 = vadd.f32 %v1205_v18, %v2014_v0  ;;  %v1208_v56 = vadd.f32 %v1465_v16, %v1207_v20  ;;  %v1638_v22 = vpop.f32.mrb[35].mxu1 }
 0x7cf   :  { %v2253_v23 = vadd.f32 %v1208_v56, %v2019_v1  ;;  %v1215_v24 = vsel %vm97_vm0, %v2250_v21, 0.0 }
 0x7d0   :  { %1216 = vadd.xlane.f32.xlu0 %v1215_v24 }
 0x7d1   :  { %v1218_v25 = vsel %vm97_vm0, %v2253_v23, 0.0 }
 0x7d2   :  { %1219 = vadd.xlane.f32.xlu1 %v1218_v25 }
 0x85d   :  { %v1217_v26 = vpop.xlane.xlu0 %1216 }
 0x85e   :  { %v1221_v27 = vmul.f32 0.03125, %v1217_v26 }
 0x85f   :  { %v1220_v28 = vpop.xlane.xlu1 %1219 }
 0x860   :  { %v1223_v29 = vsub.f32 %v2250_v21, %v1221_v27  ;;  %v1222_v0 = vmul.f32 0.03125, %v1220_v28 }
 0x862   :  { %v1224_v30 = vsub.f32 %v2253_v23, %v1222_v0  ;;  %v1225_v31 = vmul.f32 %v1223_v29, %v1223_v29 }
 0x864   :  { %v1227_v1 = vsel %vm97_vm0, %v1225_v31, 0.0  ;;  %v1226_v32 = vmul.f32 %v1224_v30, %v1224_v30 }
 0x865   :  { %1228 = vadd.xlane.f32.xlu0 %v1227_v1 }
 0x866   :  { %v1230_v33 = vsel %vm97_vm0, %v1226_v32, 0.0 }
 0x869   :  { %1231 = vadd.xlane.f32.xlu0 %v1230_v33 }
 0x8f2   :  { %v1229_v36 = vpop.xlane.xlu0 %1228 }
 0x8f3   :  { %v1233_v38 = vmul.f32 0.03125, %v1229_v36 }
 0x8f5   :  { %v1235_v39 = vadd.f32 1e-05, %v1233_v38 }
 0x8f6   :  { %v1232_v40 = vpop.xlane.xlu0 %1231 }
 0x8f7   :  { %1751 = vrsqrt.f32 %v1235_v39  ;;  %v1234_v41 = vmul.f32 0.03125, %v1232_v40 }
 0x8f9   :  { %v1236_v55 = vadd.f32 1e-05, %v1234_v41 }
 0x8fb   :  { %1753 = vrsqrt.f32 %v1236_v55 }
 0x901   :  { %v1752_v43 = vpop.eup %1751 }
 0x902   :  { %v1239_v62 = vmul.f32 %v1752_v43, %v1223_v29 }
 0x904   :  { %v1247_v45 = vmul.f32 %v1469_v37, %v1239_v62 }
 0x905   :  { %v1754_v44 = vpop.eup %1753 }
 0x906   :  { %v1240_v46 = vmul.f32 %v1754_v44, %v1224_v30  ;;  %v1255_v49 = vadd.f32 %v1470_v47, %v1247_v45 }
 0x908   :  { %v1248_v48 = vmul.f32 %v1469_v37, %v1240_v46 }
 0x90a   :  { %v1256_v52 = vadd.f32 %v1470_v47, %v1248_v48 }
 0x90c   :  { %v1257_v53 = vpack.c.bf16 %v1256_v52, %v1255_v49 }
 0x90e   :  { %1644 = vmatmul.mubr.msk.bf16.vlgmr.msra.gmra.mrb[36].mxu0 %vm97_vm0, %v1257_v53 }
 0x9e1   :  { %v1318_v63 = vpop.f32.mrb[36].mxu0 }
 0x9e2   :  { %v1319_v2 = vadd.f32 %v1471_v60, %v1318_v63  ;;  %v1645_v3 = vpop.f32.mrb[37].mxu0 }
 0x9e3   :  { %v1321_v4 = vpop.f32.mrb[38].mxu0 }
 0x9e4   :  { %v1327_v5 = vmul.f32 0.70710677, %v1319_v2  ;;  %v1322_v61 = vadd.f32 %v1471_v60, %v1321_v4  ;;  %v1646_v6 = vpop.f32.mrb[39].mxu0  ;;  %v1325_v50 = vmul.f32 0.5, %v1319_v2 }
 0x9e6   :  { %1755 = verf.f32 %v1327_v5  ;;  %v1328_v7 = vmul.f32 0.70710677, %v1322_v61  ;;  %v1326_v42 = vmul.f32 0.5, %v1322_v61 }
 0x9e8   :  { %1757 = verf.f32 %v1328_v7 }
 0x9f0   :  { %v1756_v15 = vpop.eup %1755 }
 0x9f1   :  { %v1331_v8 = vadd.f32 1.0, %v1756_v15 }
 0x9f2   :  { %v1758_v9 = vpop.eup %1757 }
 0x9f3   :  { %v1332_v51 = vadd.f32 1.0, %v1758_v9  ;;  %v1333_v10 = vmul.f32 %v1331_v8, %v1325_v50 }
 0x9f5   :  { %v1334_v11 = vmul.f32 %v1332_v51, %v1326_v42 }
 0x9f7   :  { %v1335_v12 = vpack.c.bf16 %v1334_v11, %v1333_v10 }
 0x9f9   :  { %1656 = vmatmul.mubr.msk.bf16.vlgmr.msra.gmra.mrb[36].mxu1 %vm1375_vm6, %v1335_v12 }
 0xacc   :  { %v1413_v14 = vpop.f32.mrb[36].mxu1 }
 0xacd   :  { %v1414_v16 = vadd.f32 %v1475_v13, %v1413_v14  ;;  %v1657_v17 = vpop.f32.mrb[37].mxu1 }
 0xace   :  { %v1416_v18 = vpop.f32.mrb[38].mxu1 }
 0xacf   :  { %v1420_v19 = vadd.f32 %v1414_v16, %v2250_v21  ;;  %v1417_v20 = vadd.f32 %v1475_v13, %v1416_v18  ;;  %v1658_v56 = vpop.f32.mrb[39].mxu1 }
 0xad1   :  { %1422 = vst.msk [vmem:[#allocation10] sm:$0xff] %vm97_vm0, %v1420_v19  ;;  %v1421_v22 = vadd.f32 %v1417_v20, %v2253_v23 }
 0xad3   :  { %1423 = vst.msk [vmem:[#allocation10 + $0x8] sm:$0xff] %vm97_vm0, %v1421_v22 }
 0xad4   :  { %1858 = shalt.err (!%p1855_p8)
}
 0xad5   :  { %s1859_s16 = scalar_lea.hbm %s2322_s13, 256 }
 0xad6   :  { %p1860_p9 = scmp.ne.s32.totalorder %s2322_s13, %s1859_s16  ;;  %p1863_p10 = scmp.lt.u32.totalorder %s1859_s16, %s2322_s13 }
 0xad8   :  { %p1865_p11 = pnand %p1863_p10, %p1860_p9 }
 0xada   :  { %1868 = shalt.err (!%p1865_p11)
}
 0xadb   :  { %s1892_s22 = smov 128  }
 0xadc   :  { %1435 = dma.vmem_to_hbm [thread:$0]  %s1430_s1, 256, %s2322_s13, [#allocation4], %s1892_s22, %s1892_s22, %s1888_s26  }
 0xadd   :  { %1875 = dma.done.wait [#allocation4], 256  }
 0xade   :  { %1876 = vsyncadd [#allocation4], 4294967040 }
 0xadf   :  { %1439 = vsyncpa [#allocation3], 1 }
 0xae0   :  { %1440 = vsyncpa [#allocation6], 1 }
 0xae1   :  { %1441 = vsyncpa [#allocation9], 1 }
 0xae2   :  { %1442 = vsyncpa [#allocation4], 1 }

// kernel: tpu_custom_call.1
= control target key start
LH: loop header
LB: loop body
LE: loop exit
PB: predicated region body
PF: predicated region fallthrough
CT: control target
= control target key end

     0   :  { %18 = vsyncpa [#allocation3], 0  ;;  %s2309_s0 = inlined_call_operand.vmem [shape: f32[2,8,32], index: 0, kind: input, shape index: {}]   ;;  %s2310_s1 = inlined_call_operand.vmem [shape: f32[1,32], index: 1, kind: input, shape index: {}]   ;;  %s2311_s2 = inlined_call_operand.vmem [shape: f32[1,32], index: 2, kind: input, shape index: {}]   ;;  %s2312_s3 = inlined_call_operand.vmem [shape: bf16[32,96], index: 3, kind: input, shape index: {}]   ;;  %s2313_s4 = inlined_call_operand.hbm [shape: f32[1,96], index: 4, kind: input, shape index: {}]   ;;  %s2314_s5 = inlined_call_operand.vmem [shape: bf16[32,32], index: 5, kind: input, shape index: {}]   ;;  %s2315_s6 = inlined_call_operand.hbm [shape: f32[1,32], index: 6, kind: input, shape index: {}]   ;;  %s2316_s7 = inlined_call_operand.hbm [shape: f32[1,32], index: 7, kind: input, shape index: {}]   ;;  %s2317_s8 = inlined_call_operand.hbm [shape: f32[1,32], index: 8, kind: input, shape index: {}]   ;;  %s2318_s9 = inlined_call_operand.vmem [shape: bf16[32,64], index: 9, kind: input, shape index: {}]   ;;  %s2319_s10 = inlined_call_operand.vmem [shape: f32[1,64], index: 10, kind: input, shape index: {}]   ;;  %s2320_s11 = inlined_call_operand.vmem [shape: bf16[64,32], index: 11, kind: input, shape index: {}]   ;;  %s2321_s12 = inlined_call_operand.vmem [shape: f32[1,32], index: 12, kind: input, shape index: {}]   ;;  %s2322_s13 = inlined_call_operand.hbm [shape: f32[2,8,32], index: 13, kind: output, shape index: {}]  }
   0x1   :  { %19 = vsyncpa [#allocation6], 0 }
   0x2   :  { %20 = vsyncpa [#allocation9], 0 }
   0x3   :  { %21 = vsyncpa [#allocation4], 0  ;;  %s1877_s25 = smov [#allocation5]   ;;  %s1878_s27 = smov [#allocation2]  }
   0x4   :  { %s48_s26 = sshll.u32 %s1877_s25, 4  ;;  %s36_s28 = sshll.u32 %s1878_s27, 4  ;;  %s49_s26 = int_to_ptr.vmem [resolvable:$true] %s48_s26  ;;  %s37_s28 = int_to_ptr.vmem [resolvable:$true] %s36_s28 }
   0x5   :  { %s1759_s14 = scalar_lea.hbm %s2315_s6, 16 }
   0x6   :  { %p1760_p0 = scmp.ne.s32.totalorder %s2315_s6, %s1759_s14  ;;  %p1763_p1 = scmp.lt.u32.totalorder %s1759_s14, %s2315_s6 }
   0x8   :  { %p1765_p2 = pnand %p1763_p1, %p1760_p0 }
   0xa   :  { %1768 = shalt.err (!%p1765_p2)
}
   0xb   :  { %s1769_s19 = scalar_lea.vmem %s49_s26, 16  ;;  %s1773_s20 = scalar_lea.vmem %s49_s26, 32 }
   0xc   :  { %p1770_p3 = scmp.ne.s32.totalorder %s49_s26, %s1769_s19  ;;  %p1774_p4 = scmp.lt.s32.totalorder %s49_s26, %s49_s26 }
   0xd   :  { %p1775_p5 = scmp.lt.s32.totalorder %s1773_s20, %s1769_s19 }
   0xf   :  { %p1776_p6 = por %p1775_p5, %p1774_p4 }
  0x11   :  { %p1777_p7 = pnand %p1776_p6, %p1770_p3 }
  0x13   :  { %1780 = shalt.err (!%p1777_p7)
}
  0x14   :  { %51 = dma.hbm_to_vmem [thread:$0]  %s2315_s6, 16, %s49_s26, [#allocation6]  }
  0x15   :  { %s1781_s25 = scalar_lea.hbm %s2313_s4, 16 }
  0x16   :  { %p1782_p8 = scmp.ne.s32.totalorder %s2313_s4, %s1781_s25  ;;  %p1785_p9 = scmp.lt.u32.totalorder %s1781_s25, %s2313_s4 }
  0x18   :  { %p1787_p10 = pnand %p1785_p9, %p1782_p8 }
  0x1a   :  { %1790 = shalt.err (!%p1787_p10)
}
  0x1b   :  { %s1791_s15 = scalar_lea.vmem %s37_s28, 16  ;;  %s1795_s16 = scalar_lea.vmem %s37_s28, 32 }
  0x1c   :  { %p1792_p11 = scmp.ne.s32.totalorder %s37_s28, %s1791_s15  ;;  %p1796_p12 = scmp.lt.s32.totalorder %s37_s28, %s37_s28 }
  0x1d   :  { %p1797_p13 = scmp.lt.s32.totalorder %s1795_s16, %s1791_s15 }
  0x1f   :  { %p1798_p0 = por %p1797_p13, %p1796_p12 }
  0x21   :  { %p1799_p1 = pnand %p1798_p0, %p1792_p11 }
  0x23   :  { %1802 = shalt.err (!%p1799_p1)
}
  0x24   :  { %39 = dma.hbm_to_vmem [thread:$0]  %s2313_s4, 16, %s37_s28, [#allocation3]  }
  0x25   :  { %s1879_s17 = smov [#allocation7]   ;;  %s1880_s19 = smov [#allocation8]  }
  0x26   :  { %s58_s18 = sshll.u32 %s1879_s17, 4  ;;  %s68_s20 = sshll.u32 %s1880_s19, 4  ;;  %s59_s18 = int_to_ptr.vmem [resolvable:$true] %s58_s18  ;;  %s69_s20 = int_to_ptr.vmem [resolvable:$true] %s68_s20 }
  0x27   :  { %s1803_s23 = scalar_lea.hbm %s2316_s7, 16 }
  0x28   :  { %p1804_p2 = scmp.ne.s32.totalorder %s2316_s7, %s1803_s23  ;;  %p1807_p3 = scmp.lt.u32.totalorder %s1803_s23, %s2316_s7 }
  0x2a   :  { %p1809_p4 = pnand %p1807_p3, %p1804_p2 }
  0x2c   :  { %1812 = shalt.err (!%p1809_p4)
}
  0x2d   :  { %s1813_s4 = scalar_lea.vmem %s59_s18, 16  ;;  %s1817_s28 = scalar_lea.vmem %s59_s18, 32 }
  0x2e   :  { %p1814_p5 = scmp.ne.s32.totalorder %s59_s18, %s1813_s4  ;;  %p1818_p6 = scmp.lt.s32.totalorder %s59_s18, %s59_s18 }
  0x2f   :  { %p1819_p7 = scmp.lt.s32.totalorder %s1817_s28, %s1813_s4 }
  0x31   :  { %p1820_p8 = por %p1819_p7, %p1818_p6 }
  0x33   :  { %p1821_p9 = pnand %p1820_p8, %p1814_p5 }
  0x35   :  { %1824 = shalt.err (!%p1821_p9)
}
  0x36   :  { %61 = dma.hbm_to_vmem [thread:$0]  %s2316_s7, 16, %s59_s18, [#allocation6]  }
  0x37   :  { %s1825_s6 = scalar_lea.hbm %s2317_s8, 16 }
  0x38   :  { %p1826_p10 = scmp.ne.s32.totalorder %s2317_s8, %s1825_s6  ;;  %p1829_p11 = scmp.lt.u32.totalorder %s1825_s6, %s2317_s8 }
  0x3a   :  { %p1831_p12 = pnand %p1829_p11, %p1826_p10 }
  0x3c   :  { %1834 = shalt.err (!%p1831_p12)
}
  0x3d   :  { %s1835_s22 = scalar_lea.vmem %s69_s20, 16  ;;  %s1839_s23 = scalar_lea.vmem %s69_s20, 32 }
  0x3e   :  { %p1836_p13 = scmp.ne.s32.totalorder %s69_s20, %s1835_s22  ;;  %p1840_p0 = scmp.lt.s32.totalorder %s69_s20, %s69_s20 }
  0x3f   :  { %p1841_p1 = scmp.lt.s32.totalorder %s1839_s23, %s1835_s22 }
  0x41   :  { %p1842_p2 = por %p1841_p1, %p1840_p0 }
  0x43   :  { %p1843_p3 = pnand %p1842_p2, %p1836_p13 }
  0x45   :  { %1846 = shalt.err (!%p1843_p3)
}
  0x46   :  { %71 = dma.hbm_to_vmem [thread:$0]  %s2317_s8, 16, %s69_s20, [#allocation9]  }
  0x47   :  { %1869 = dma.done.wait [#allocation3], 16  }
  0x48   :  { %1870 = vsyncadd [#allocation3], 4294967280 }
  0x49   :  { %1871 = dma.done.wait [#allocation6], 32  }
  0x4a   :  { %1872 = vsyncadd [#allocation6], 4294967264 }
  0x4b   :  { %1873 = dma.done.wait [#allocation9], 16  }
  0x4c   :  { %1874 = vsyncadd [#allocation9], 4294967280  ;;  %vm97_vm0 = vcmask 261120   ;;  %v2014_v0 = vld [vmem:[%s2309_s0] sm:$0xff]  ;;  %v2019_v1 = vld [vmem:[%s2309_s0 + $0x8] sm:$0xff]  ;;  %v1881_v15 = vmov 0.0  }
  0x4d   :  { %v98_v2 = vsel %vm97_vm0, %v2014_v0, 0.0  ;;  %v101_v3 = vsel %vm97_vm0, %v2019_v1, 0.0  ;;  %v1705_v14 = vld [vmem:[%s2312_s3] sm:$0xff]   ;;  %1527 = vmatprep.subr.bf16.mxu0 %v1881_v15  ;;  %1535 = vmatprep.subr.bf16.mxu1 %v1881_v15  ;;  %v1706_v16 = vld [vmem:[%s2312_s3 + $0x8] sm:$0xff]   ;;  %vm1882_vm1 = vmmov 0   ;;  %s1885_s15 = smov 104  }
  0x4e   :  { %99 = vadd.xlane.f32.xlu0 %v98_v2  ;;  %1528 = vmatpush3.bf16.msra.mxu0 %v1705_v14  ;;  %v1443_v25 = vld [vmem:[%s2310_s1] ss:$0 sm:$0xff]  ;;  %s1883_s1 = smov 112   ;;  %s1886_s16 = smov 96   ;;  %vm240_vm2 = vcmask 64512   ;;  %vm731_vm3 = vcmask 1043456  }
  0x4f   :  { %1531 = vmatprep.mubr.msk.bf16.mxu0 %vm1882_vm1, %v1881_v15  ;;  %1529 = vmatprep.subr.bf16.mxu0 %v1881_v15  ;;  %v1444_v29 = vld [vmem:[%s2311_s2] ss:$0 sm:$0xff]  ;;  %s1884_s2 = smov 120   ;;  %s1887_s6 = smov 64   ;;  %vm1137_vm4 = vcmask 130048   ;;  %vm1140_vm5 = vcmask 195584  }
  0x50   :  { %1537 = vmatprep.mubr.msk.bf16.mxu1 %vm1882_vm1, %v1881_v15  ;;  %v1445_v34 = vld [vmem:[#allocation2] ss:$0 sm:$0xff]  ;;  %s1888_s26 = smov 8   ;;  %s1889_s23 = smov 16   ;;  %vm1375_vm6 = vcmask 523264  }
  0x51   :  { %s1890_s7 = smov 24   ;;  %s1891_s14 = smov [#allocation10]  }
  0x52   :  { %102 = vadd.xlane.f32.xlu0 %v101_v3  ;;  %1530 = vmatpush3.bf16.msra.mxu0 %v1706_v16 }
  0x53   :  { %1541 = vmatprep.subr.bf16.mxu0 %v1881_v15 }
  0xdb   :  { %v100_v4 = vpop.xlane.xlu0 %99 }
  0xdc   :  { %v105_v5 = vmul.f32 0.03125, %v100_v4 }
  0xde   :  { %v107_v6 = vsub.f32 %v2014_v0, %v105_v5 }
  0xdf   :  { %v103_v7 = vpop.xlane.xlu0 %102 }
  0xe0   :  { %v106_v8 = vmul.f32 0.03125, %v103_v7  ;;  %v109_v9 = vmul.f32 %v107_v6, %v107_v6 }
  0xe2   :  { %v108_v10 = vsub.f32 %v2019_v1, %v106_v8  ;;  %v111_v11 = vsel %vm97_vm0, %v109_v9, 0.0 }
  0xe3   :  { %112 = vadd.xlane.f32.xlu1 %v111_v11 }
  0xe4   :  { %v110_v12 = vmul.f32 %v108_v10, %v108_v10 }
  0xe6   :  { %v114_v13 = vsel %vm97_vm0, %v110_v12, 0.0 }
  0xe7   :  { %115 = vadd.xlane.f32.xlu1 %v114_v13 }
 0x170   :  { %v113_v17 = vpop.xlane.xlu1 %112 }
 0x171   :  { %v117_v18 = vmul.f32 0.03125, %v113_v17 }
 0x173   :  { %v119_v19 = vadd.f32 1e-05, %v117_v18 }
 0x174   :  { %v116_v20 = vpop.xlane.xlu1 %115 }
 0x175   :  { %1715 = vrsqrt.f32 %v119_v19  ;;  %v118_v21 = vmul.f32 0.03125, %v116_v20 }
 0x177   :  { %v120_v22 = vadd.f32 1e-05, %v118_v21 }
 0x179   :  { %1717 = vrsqrt.f32 %v120_v22 }
 0x17f   :  { %v1716_v23 = vpop.eup %1715 }
 0x180   :  { %v123_v24 = vmul.f32 %v1716_v23, %v107_v6 }
 0x182   :  { %v131_v28 = vmul.f32 %v1443_v25, %v123_v24 }
 0x183   :  { %v1718_v26 = vpop.eup %1717 }
 0x184   :  { %v124_v27 = vmul.f32 %v1718_v26, %v108_v10  ;;  %v139_v31 = vadd.f32 %v1444_v29, %v131_v28 }
 0x186   :  { %v132_v30 = vmul.f32 %v1443_v25, %v124_v27 }
 0x188   :  { %v140_v32 = vadd.f32 %v1444_v29, %v132_v30 }
 0x18a   :  { %v141_v33 = vpack.c.bf16 %v140_v32, %v139_v31 }
 0x18c   :  { %1532 = vmatmul.mubr.msk.bf16.vlgmr.msra.gmra.mrb[0].mxu0 %vm97_vm0, %v141_v33 }
 0x18d   :  { %1543 = vmatprep.mubr.msk.bf16.mxu0 %vm1882_vm1, %v1881_v15 }
 0x25f   :  { %v202_v35 = vpop.f32.mrb[0].mxu0 }
 0x260   :  { %v1533_v36 = vpop.f32.mrb[1].mxu0  ;;  %v203_v38 = vadd.f32 %v1445_v34, %v202_v35 }
 0x261   :  { %v205_v37 = vpop.f32.mrb[2].mxu0 }
 0x262   :  { %v206_v39 = vadd.f32 %v1445_v34, %v205_v37  ;;  %v1534_v40 = vpop.f32.mrb[3].mxu0  ;;  %v229_v43 = vpack.c.bf16 %v203_v38, %v203_v38 }
 0x264   :  { %v1680_v41 = vpack.i.bf16 %v206_v39, %v203_v38  ;;  %v2052_v42 = vpack.c.bf16 %v206_v39, %v206_v39 }
 0x266   :  { %1681 = vrot.lane.b32.xlu1 %v1680_v41, %s1883_s1  ;;  %1676 = vrot.lane.b32.xlu0 %v1680_v41, %s1884_s2  ;;  %s1429_s1 = sshll.u32 %s1891_s14, 4  ;;  %s1430_s1 = int_to_ptr.vmem [resolvable:$true] %s1429_s1 }
 0x267   :  { %s1847_s2 = scalar_lea.vmem %s1430_s1, 256  ;;  %p1852_p5 = scmp.lt.s32.totalorder %s1430_s1, %s1430_s1 }
 0x268   :  { %p1848_p4 = scmp.ne.s32.totalorder %s1430_s1, %s1847_s2  ;;  %p1853_p6 = scmp.lt.s32.totalorder %s1847_s2, %s1847_s2 }
 0x26a   :  { %1686 = vrot.lane.b32.xlu1 %v1680_v41, %s1885_s15  ;;  %288 = vrot.lane.b32.xlu0 %v2052_v42, %s1886_s16  ;;  %p1854_p7 = por %p1853_p6, %p1852_p5 }
 0x26c   :  { %p1855_p8 = pnand %p1854_p7, %p1848_p4 }
 0x26e   :  { %238 = vrot.lane.b32.xlu1 %v229_v43, %s1886_s16 }
 0x2d8   :  { %v1682_v44 = vpop.permute.xlu1 %1681  ;;  %v1677_v45 = vpop.permute.xlu0 %1676 }
 0x2d9   :  { %v1679_v46 = vunpack.i.h.bf16 %v1677_v45  ;;  %v1678_v47 = vunpack.i.l.bf16 %v1677_v45  ;;  %v1684_v48 = vunpack.i.h.bf16 %v1682_v44  ;;  %v1683_v49 = vunpack.i.l.bf16 %v1682_v44 }
 0x2db   :  { %v2057_v50 = vpack.c.bf16 %v1679_v46, %v1679_v46  ;;  %v2059_v51 = vpack.c.bf16 %v1678_v47, %v1678_v47  ;;  %v2066_v55 = vpack.c.bf16 %v1684_v48, %v1684_v48  ;;  %v2068_v56 = vpack.c.bf16 %v1683_v49, %v1683_v49 }
 0x2dc   :  { %v1687_v52 = vpop.permute.xlu1 %1686  ;;  %v289_v53 = vpop.permute.xlu0 %288 }
 0x2dd   :  { %v294_v54 = vsel %vm240_vm2, %v289_v53, 0  ;;  %337 = vrot.lane.b32.xlu1 %v2059_v51, %s1886_s16  ;;  %386 = vrot.lane.b32.xlu0 %v2057_v50, %s1886_s16  ;;  %v1689_v57 = vunpack.i.h.bf16 %v1687_v52  ;;  %v1688_v58 = vunpack.i.l.bf16 %v1687_v52 }
 0x2de   :  { %1542 = vmatpush3.bf16.xpose.msra.mxu0 %v294_v54 }
 0x2df   :  { %1553 = vmatprep.subr.bf16.mxu0 %v1881_v15  ;;  %v2076_v61 = vpack.c.bf16 %v1689_v57, %v1689_v57  ;;  %v2078_v62 = vpack.c.bf16 %v1688_v58, %v1688_v58 }
 0x2e0   :  { %v239_v59 = vpop.permute.xlu1 %238 }
 0x2e1   :  { %435 = vrot.lane.b32.xlu1 %v2068_v56, %s1886_s16  ;;  %484 = vrot.lane.b32.xlu0 %v2066_v55, %s1886_s16  ;;  %v245_v60 = vsel %vm240_vm2, %v239_v59, 0 }
 0x2e2   :  { %1536 = vmatpush3.bf16.xpose.msra.mxu1 %v245_v60 }
 0x2e3   :  { %1547 = vmatprep.subr.bf16.mxu1 %v1881_v15 }
 0x2e5   :  { %533 = vrot.lane.b32.xlu1 %v2078_v62, %s1886_s16  ;;  %582 = vrot.lane.b32.xlu0 %v2076_v61, %s1886_s16 }
 0x2e6   :  { %1544 = vmatmul.mubr.msk.bf16.vlgmr.msra.gmra.mrb[4].mxu0 %vm240_vm2, %v2052_v42 }
 0x2e7   :  { %1555 = vmatprep.mubr.msk.bf16.mxu0 %vm1882_vm1, %v1881_v15 }
 0x2e9   :  { %1538 = vmatmul.mubr.msk.bf16.vlgmr.msra.gmra.mrb[0].mxu1 %vm240_vm2, %v229_v43  ;;  %726 = vrot.lane.b32.xlu1 %v229_v43, %s1887_s6 }
 0x2ea   :  { %1549 = vmatprep.mubr.msk.bf16.mxu1 %vm1882_vm1, %v1881_v15 }
 0x34f   :  { %v338_v63 = vpop.permute.xlu1 %337  ;;  %v387_v2 = vpop.permute.xlu0 %386 }
 0x350   :  { %v343_v3 = vsel %vm240_vm2, %v338_v63, 0  ;;  %v392_v4 = vsel %vm240_vm2, %v387_v2, 0 }
 0x351   :  { %1548 = vmatpush3.bf16.xpose.msra.mxu1 %v343_v3  ;;  %1554 = vmatpush3.bf16.xpose.msra.mxu0 %v392_v4 }
 0x352   :  { %1559 = vmatprep.subr.bf16.mxu1 %v1881_v15  ;;  %1565 = vmatprep.subr.bf16.mxu0 %v1881_v15 }
 0x353   :  { %v436_v5 = vpop.permute.xlu1 %435  ;;  %v485_v6 = vpop.permute.xlu0 %484 }
 0x354   :  { %v441_v7 = vsel %vm240_vm2, %v436_v5, 0  ;;  %v490_v8 = vsel %vm240_vm2, %v485_v6, 0 }
 0x357   :  { %v534_v9 = vpop.permute.xlu1 %533  ;;  %v583_v10 = vpop.permute.xlu0 %582 }
 0x358   :  { %1550 = vmatmul.mubr.msk.bf16.vlgmr.msra.gmra.mrb[4].mxu1 %vm240_vm2, %v2059_v51  ;;  %1556 = vmatmul.mubr.msk.bf16.vlgmr.msra.gmra.mrb[8].mxu0 %vm240_vm2, %v2057_v50  ;;  %v539_v11 = vsel %vm240_vm2, %v534_v9, 0  ;;  %v588_v12 = vsel %vm240_vm2, %v583_v10, 0 }
 0x359   :  { %1560 = vmatpush3.bf16.xpose.msra.mxu1 %v441_v7  ;;  %1566 = vmatpush3.bf16.xpose.msra.mxu0 %v490_v8 }
 0x35a   :  { %1561 = vmatprep.mubr.msk.bf16.mxu1 %vm1882_vm1, %v1881_v15  ;;  %1567 = vmatprep.mubr.msk.bf16.mxu0 %vm1882_vm1, %v1881_v15 }
 0x35b   :  { %1571 = vmatprep.subr.bf16.mxu1 %v1881_v15  ;;  %1577 = vmatprep.subr.bf16.mxu0 %v1881_v15  ;;  %v727_v13 = vpop.permute.xlu1 %726 }
 0x35c   :  { %v733_v14 = vsel %vm731_vm3, %v727_v13, 0 }
 0x360   :  { %1562 = vmatmul.mubr.msk.bf16.vlgmr.msra.gmra.mrb[8].mxu1 %vm240_vm2, %v2068_v56  ;;  %1568 = vmatmul.mubr.msk.bf16.vlgmr.msra.gmra.mrb[12].mxu0 %vm240_vm2, %v2066_v55 }
 0x361   :  { %1572 = vmatpush3.bf16.xpose.msra.mxu1 %v539_v11  ;;  %1578 = vmatpush3.bf16.xpose.msra.mxu0 %v588_v12 }
 0x362   :  { %1573 = vmatprep.mubr.msk.bf16.mxu1 %vm1882_vm1, %v1881_v15  ;;  %1579 = vmatprep.mubr.msk.bf16.mxu0 %vm1882_vm1, %v1881_v15 }
 0x363   :  { %1583 = vmatprep.subr.bf16.mxu1 %v1881_v15  ;;  %1589 = vmatprep.subr.bf16.mxu0 %v1881_v15 }
 0x368   :  { %1574 = vmatmul.mubr.msk.bf16.vlgmr.msra.gmra.mrb[12].mxu1 %vm240_vm2, %v2078_v62  ;;  %1580 = vmatmul.mubr.msk.bf16.vlgmr.msra.gmra.mrb[16].mxu0 %vm240_vm2, %v2076_v61 }
 0x369   :  { %1584 = vmatpush3.bf16.msra.mxu1 %v733_v14  ;;  %1591 = vmatprep.mubr.msk.bf16.mxu0 %vm1882_vm1, %v1881_v15 }
 0x36a   :  { %1585 = vmatprep.mubr.msk.bf16.mxu1 %vm1882_vm1, %v1881_v15  ;;  %1595 = vmatprep.subr.bf16.mxu1 %v1881_v15 }
 0x3b9   :  { %v330_v16 = vpop.f32.mrb[4].mxu0 }
 0x3ba   :  { %v1545_v17 = vpop.f32.mrb[5].mxu0  ;;  %v633_v18 = vsel %vm240_vm2, %v330_v16, -inf }
 0x3bb   :  { %634 = vmax.xlane.f32.xlu0 %v633_v18  ;;  %v333_v19 = vpop.f32.mrb[6].mxu0 }
 0x3bc   :  { %v1546_v20 = vpop.f32.mrb[7].mxu0  ;;  %v281_v21 = vpop.f32.mrb[0].mxu1 }
 0x3bd   :  { %v1539_v22 = vpop.f32.mrb[1].mxu1  ;;  %v630_v23 = vsel %vm240_vm2, %v281_v21, -inf }
 0x3be   :  { %v284_v24 = vpop.f32.mrb[2].mxu1  ;;  %631 = vmax.xlane.f32.xlu1 %v630_v23 }
 0x3bf   :  { %v1540_v25 = vpop.f32.mrb[3].mxu1 }
 0x42b   :  { %v379_v26 = vpop.f32.mrb[4].mxu1  ;;  %v428_v27 = vpop.f32.mrb[8].mxu0 }
 0x42c   :  { %v1551_v28 = vpop.f32.mrb[5].mxu1  ;;  %v1557_v29 = vpop.f32.mrb[9].mxu0  ;;  %v636_v30 = vsel %vm240_vm2, %v379_v26, -inf  ;;  %v639_v35 = vsel %vm240_vm2, %v428_v27, -inf }
 0x42d   :  { %v382_v31 = vpop.f32.mrb[6].mxu1  ;;  %637 = vmax.xlane.f32.xlu0 %v636_v30  ;;  %v431_v32 = vpop.f32.mrb[10].mxu0 }
 0x42e   :  { %v1552_v33 = vpop.f32.mrb[7].mxu1  ;;  %v1558_v34 = vpop.f32.mrb[11].mxu0 }
 0x431   :  { %640 = vmax.xlane.f32.xlu0 %v639_v35 }
 0x433   :  { %v477_v36 = vpop.f32.mrb[8].mxu1  ;;  %v2135_v37 = vpop.f32.mrb[12].mxu0 }
 0x434   :  { %v1563_v38 = vpop.f32.mrb[9].mxu1  ;;  %v1569_v39 = vpop.f32.mrb[13].mxu0  ;;  %v642_v40 = vsel %vm240_vm2, %v477_v36, -inf  ;;  %v645_v41 = vsel %vm240_vm2, %v2135_v37, -inf }
 0x435   :  { %643 = vmax.xlane.f32.xlu1 %v642_v40  ;;  %v480_v43 = vpop.f32.mrb[10].mxu1  ;;  %646 = vmax.xlane.f32.xlu0 %v645_v41  ;;  %v529_v44 = vpop.f32.mrb[14].mxu0 }
 0x436   :  { %v1564_v45 = vpop.f32.mrb[11].mxu1  ;;  %v1570_v46 = vpop.f32.mrb[15].mxu0 }
 0x43b   :  { %v575_v47 = vpop.f32.mrb[12].mxu1  ;;  %v2140_v48 = vpop.f32.mrb[16].mxu0 }
 0x43c   :  { %v1575_v49 = vpop.f32.mrb[13].mxu1  ;;  %v1581_v52 = vpop.f32.mrb[17].mxu0  ;;  %v648_v53 = vsel %vm240_vm2, %v575_v47, -inf  ;;  %v651_v54 = vsel %vm240_vm2, %v2140_v48, -inf }
 0x43d   :  { %649 = vmax.xlane.f32.xlu1 %v648_v53  ;;  %v578_v57 = vpop.f32.mrb[14].mxu1  ;;  %652 = vmax.xlane.f32.xlu0 %v651_v54  ;;  %v627_v58 = vpop.f32.mrb[18].mxu0 }
 0x43e   :  { %v1576_v59 = vpop.f32.mrb[15].mxu1  ;;  %v1582_v60 = vpop.f32.mrb[19].mxu0 }
 0x448   :  { %v635_v63 = vpop.xlane.xlu0 %634 }
 0x449   :  { %v655_v2 = vsub.f32 %v330_v16, %v635_v63 }
 0x44b   :  { %v632_v3 = vpop.xlane.xlu1 %631  ;;  %v664_v4 = vmul.f32 1.442695, %v655_v2 }
 0x44c   :  { %v654_v5 = vsub.f32 %v281_v21, %v632_v3 }
 0x44d   :  { %1719 = vpow2.f32 %v664_v4 }
 0x44e   :  { %823 = vrot.lane.b32.xlu1 %v2059_v51, %s1887_s6  ;;  %v662_v6 = vmul.f32 1.442695, %v654_v5 }
 0x450   :  { %1721 = vpow2.f32 %v662_v6 }
 0x452   :  { %871 = vrot.lane.b32.xlu1 %v2057_v50, %s1887_s6 }
 0x453   :  { %775 = vrot.lane.b32.xlu0 %v2052_v42, %s1887_s6 }
 0x457   :  { %v1720_v7 = vpop.eup %1719 }
 0x458   :  { %v681_v8 = vsel %vm240_vm2, %v1720_v7, 0.0 }
 0x45a   :  { %v2152_v9 = vpop.eup %1721 }
 0x45b   :  { %v678_v50 = vsel %vm240_vm2, %v2152_v9, 0.0 }
 0x472   :  { %682 = vadd.xlane.f32.xlu0 %v681_v8 }
 0x476   :  { %679 = vadd.xlane.f32.xlu1 %v678_v50 }
 0x487   :  { %919 = vrot.lane.b32.xlu1 %v2068_v56, %s1887_s6 }
 0x4ba   :  { %v638_v42 = vpop.xlane.xlu0 %637 }
 0x4bb   :  { %v656_v51 = vsub.f32 %v379_v26, %v638_v42 }
 0x4bd   :  { %v666_v10 = vmul.f32 1.442695, %v656_v51 }
 0x4be   :  { %v641_v11 = vpop.xlane.xlu0 %640 }
 0x4bf   :  { %1723 = vpow2.f32 %v666_v10  ;;  %v657_v12 = vsub.f32 %v428_v27, %v641_v11 }
 0x4c1   :  { %v668_v13 = vmul.f32 1.442695, %v657_v12 }
 0x4c2   :  { %v644_v14 = vpop.xlane.xlu1 %643  ;;  %v647_v18 = vpop.xlane.xlu0 %646 }
 0x4c3   :  { %1725 = vpow2.f32 %v668_v13  ;;  %v658_v16 = vsub.f32 %v477_v36, %v644_v14  ;;  %v659_v32 = vsub.f32 %v2135_v37, %v647_v18 }
 0x4c5   :  { %v670_v17 = vmul.f32 1.442695, %v658_v16  ;;  %v672_v33 = vmul.f32 1.442695, %v659_v32 }
 0x4c7   :  { %1727 = vpow2.f32 %v670_v17 }
 0x4c9   :  { %v2158_v19 = vpop.eup %1723 }
 0x4ca   :  { %v650_v20 = vpop.xlane.xlu1 %649  ;;  %v653_v21 = vpop.xlane.xlu0 %652  ;;  %v684_v56 = vsel %vm240_vm2, %v2158_v19, 0.0 }
 0x4cb   :  { %v660_v22 = vsub.f32 %v575_v47, %v650_v20  ;;  %685 = vadd.xlane.f32.xlu1 %v684_v56  ;;  %v661_v34 = vsub.f32 %v2140_v48, %v653_v21 }
 0x4cd   :  { %v2162_v23 = vpop.eup %1725  ;;  %v674_v24 = vmul.f32 1.442695, %v660_v22  ;;  %v676_v35 = vmul.f32 1.442695, %v661_v34 }
 0x4ce   :  { %v776_v25 = vpop.permute.xlu0 %775  ;;  %v687_v26 = vsel %vm240_vm2, %v2162_v23, 0.0  ;;  %v824_v36 = vpop.permute.xlu1 %823 }
 0x4cf   :  { %1729 = vpow2.f32 %v674_v24  ;;  %v781_v27 = vsel %vm731_vm3, %v776_v25, 0  ;;  %688 = vadd.xlane.f32.xlu0 %v687_v26  ;;  %v829_v52 = vsel %vm731_vm3, %v824_v36, 0 }
 0x4d0   :  { %1590 = vmatpush3.bf16.msra.mxu0 %v781_v27  ;;  %1731 = vpow2.f32 %v672_v33 }
 0x4d1   :  { %v2167_v28 = vpop.eup %1727  ;;  %1601 = vmatprep.subr.bf16.mxu0 %v1881_v15  ;;  %1733 = vpow2.f32 %v676_v35 }
 0x4d2   :  { %v690_v29 = vsel %vm240_vm2, %v2167_v28, 0.0  ;;  %v872_v38 = vpop.permute.xlu1 %871 }
 0x4d3   :  { %691 = vadd.xlane.f32.xlu1 %v690_v29  ;;  %v877_v47 = vsel %vm731_vm3, %v872_v38, 0 }
 0x4d9   :  { %v2172_v30 = vpop.eup %1729 }
 0x4da   :  { %v696_v31 = vsel %vm240_vm2, %v2172_v30, 0.0  ;;  %v2182_v40 = vpop.eup %1731 }
 0x4db   :  { %697 = vadd.xlane.f32.xlu1 %v696_v31  ;;  %v2186_v43 = vpop.eup %1733 }
 0x4e5   :  { %967 = vrot.lane.b32.xlu0 %v2066_v55, %s1887_s6  ;;  %v693_v55 = vsel %vm240_vm2, %v2182_v40, 0.0 }
 0x4ec   :  { %1015 = vrot.lane.b32.xlu1 %v2078_v62, %s1887_s6  ;;  %v699_v62 = vsel %vm240_vm2, %v2186_v43, 0.0 }
 0x4ff   :  { %v683_v39 = vpop.xlane.xlu0 %682 }
 0x500   :  { %1735 = vrcp.f32 %v683_v39 }
 0x503   :  { %v680_v41 = vpop.xlane.xlu1 %679 }
 0x504   :  { %1737 = vrcp.f32 %v680_v41  ;;  %694 = vadd.xlane.f32.xlu0 %v693_v55 }
 0x507   :  { %v920_v53 = vpop.permute.xlu1 %919 }
 0x508   :  { %700 = vadd.xlane.f32.xlu0 %v699_v62  ;;  %v925_v3 = vsel %vm731_vm3, %v920_v53, 0 }
 0x50a   :  { %v1736_v37 = vpop.eup %1735 }
 0x50b   :  { %v711_v44 = vmul.f32 %v1736_v37, %v1720_v7 }
 0x50d   :  { %v719_v45 = vpack.c.bf16 %v711_v44, %v711_v44 }
 0x50e   :  { %v1738_v46 = vpop.eup %1737 }
 0x50f   :  { %v710_v48 = vmul.f32 %v1738_v46, %v2152_v9  ;;  %1592 = vmatmul.mubr.msk.bf16.vlgmr.msra.gmra.mrb[20].mxu0 %vm240_vm2, %v719_v45 }
 0x510   :  { %1602 = vmatpush3.bf16.msra.mxu0 %v877_v47  ;;  %1603 = vmatprep.mubr.msk.bf16.mxu0 %vm1882_vm1, %v1881_v15  ;;  %v1707_v47 = vld [vmem:[%s2314_s5] sm:$0xff]  }
 0x511   :  { %v718_v49 = vpack.c.bf16 %v710_v48, %v710_v48  ;;  %1613 = vmatprep.subr.bf16.mxu0 %v1881_v15  ;;  %v1708_v48 = vld [vmem:[%s2314_s5 + $0x8] sm:$0xff]  }
 0x513   :  { %1586 = vmatmul.mubr.msk.bf16.vlgmr.msra.gmra.mrb[16].mxu1 %vm240_vm2, %v718_v49 }
 0x514   :  { %1596 = vmatpush3.bf16.msra.mxu1 %v829_v52  ;;  %1597 = vmatprep.mubr.msk.bf16.mxu1 %vm1882_vm1, %v1881_v15 }
 0x515   :  { %1607 = vmatprep.subr.bf16.mxu1 %v1881_v15 }
 0x51e   :  { %1063 = vrot.lane.b32.xlu0 %v2076_v61, %s1887_s6 }
 0x558   :  { %v686_v54 = vpop.xlane.xlu1 %685 }
 0x559   :  { %1739 = vrcp.f32 %v686_v54 }
 0x55c   :  { %v689_v57 = vpop.xlane.xlu0 %688 }
 0x55d   :  { %1741 = vrcp.f32 %v689_v57 }
 0x560   :  { %v692_v58 = vpop.xlane.xlu1 %691  ;;  %v968_v61 = vpop.permute.xlu0 %967 }
 0x561   :  { %1743 = vrcp.f32 %v692_v58  ;;  %v973_v9 = vsel %vm731_vm3, %v968_v61, 0 }
 0x563   :  { %v1740_v59 = vpop.eup %1739 }
 0x564   :  { %v712_v60 = vmul.f32 %v1740_v59, %v2158_v19 }
 0x566   :  { %v720_v63 = vpack.c.bf16 %v712_v60, %v712_v60 }
 0x567   :  { %v1742_v2 = vpop.eup %1741 }
 0x568   :  { %v713_v4 = vmul.f32 %v1742_v2, %v2162_v23  ;;  %1598 = vmatmul.mubr.msk.bf16.vlgmr.msra.gmra.mrb[20].mxu1 %vm240_vm2, %v720_v63  ;;  %v698_v5 = vpop.xlane.xlu1 %697 }
 0x569   :  { %1608 = vmatpush3.bf16.msra.mxu1 %v925_v3  ;;  %1745 = vrcp.f32 %v698_v5  ;;  %1609 = vmatprep.mubr.msk.bf16.mxu1 %vm1882_vm1, %v1881_v15 }
 0x56a   :  { %v721_v6 = vpack.c.bf16 %v713_v4, %v713_v4  ;;  %1619 = vmatprep.subr.bf16.mxu1 %v1881_v15 }
 0x56b   :  { %v1744_v7 = vpop.eup %1743 }
 0x56c   :  { %v714_v8 = vmul.f32 %v1744_v7, %v2167_v28  ;;  %1604 = vmatmul.mubr.msk.bf16.vlgmr.msra.gmra.mrb[24].mxu0 %vm240_vm2, %v721_v6  ;;  %v1016_v50 = vpop.permute.xlu1 %1015 }
 0x56d   :  { %1614 = vmatpush3.bf16.msra.mxu0 %v973_v9  ;;  %1615 = vmatprep.mubr.msk.bf16.mxu0 %vm1882_vm1, %v1881_v15  ;;  %v1021_v51 = vsel %vm731_vm3, %v1016_v50, 0 }
 0x56e   :  { %v722_v42 = vpack.c.bf16 %v714_v8, %v714_v8  ;;  %1625 = vmatprep.subr.bf16.mxu0 %v1881_v15 }
 0x570   :  { %1610 = vmatmul.mubr.msk.bf16.vlgmr.msra.gmra.mrb[24].mxu1 %vm240_vm2, %v722_v42 }
 0x571   :  { %1620 = vmatpush3.bf16.msra.mxu1 %v1021_v51  ;;  %1621 = vmatprep.mubr.msk.bf16.mxu1 %vm1882_vm1, %v1881_v15 }
 0x572   :  { %1631 = vmatprep.subr.bf16.mxu1 %v1881_v15 }
 0x573   :  { %v1746_v10 = vpop.eup %1745 }
 0x574   :  { %v716_v11 = vmul.f32 %v1746_v10, %v2172_v30 }
 0x576   :  { %v724_v12 = vpack.c.bf16 %v716_v11, %v716_v11 }
 0x578   :  { %1622 = vmatmul.mubr.msk.bf16.vlgmr.msra.gmra.mrb[28].mxu1 %vm240_vm2, %v724_v12 }
 0x579   :  { %1635 = vmatprep.mubr.msk.bf16.mxu1 %vm1882_vm1, %v1881_v15  ;;  %1632 = vmatpush3.bf16.msra.mxu1 %v1707_v47  ;;  %v1470_v47 = vld [vmem:[#allocation8] ss:$0 sm:$0xff] }
 0x57a   :  { %1633 = vmatprep.subr.bf16.mxu1 %v1881_v15 }
 0x57d   :  { %1634 = vmatpush3.bf16.msra.mxu1 %v1708_v48 }
 0x57e   :  { %1647 = vmatprep.subr.bf16.mxu1 %v1881_v15 }
 0x591   :  { %v695_v13 = vpop.xlane.xlu0 %694 }
 0x592   :  { %1747 = vrcp.f32 %v695_v13 }
 0x595   :  { %v701_v14 = vpop.xlane.xlu0 %700 }
 0x596   :  { %1749 = vrcp.f32 %v701_v14 }
 0x599   :  { %v1064_v18 = vpop.permute.xlu0 %1063 }
 0x59a   :  { %v1069_v21 = vsel %vm731_vm3, %v1064_v18, 0 }
 0x59c   :  { %v1748_v16 = vpop.eup %1747 }
 0x59d   :  { %v715_v17 = vmul.f32 %v1748_v16, %v2182_v40  ;;  %v1465_v16 = vld [vmem:[#allocation5] ss:$0 sm:$0xff] }
 0x59f   :  { %v723_v19 = vpack.c.bf16 %v715_v17, %v715_v17 }
 0x5a0   :  { %v1750_v20 = vpop.eup %1749 }
 0x5a1   :  { %1616 = vmatmul.mubr.msk.bf16.vlgmr.msra.gmra.mrb[28].mxu0 %vm240_vm2, %v723_v19  ;;  %v717_v56 = vmul.f32 %v1750_v20, %v2186_v43 }
 0x5a2   :  { %1626 = vmatpush3.bf16.msra.mxu0 %v1069_v21  ;;  %1627 = vmatprep.mubr.msk.bf16.mxu0 %vm1882_vm1, %v1881_v15 }
 0x5a3   :  { %1639 = vmatprep.subr.bf16.mxu0 %v1881_v15  ;;  %v725_v22 = vpack.c.bf16 %v717_v56, %v717_v56 }
 0x5a9   :  { %1628 = vmatmul.mubr.msk.bf16.vlgmr.msra.gmra.mrb[32].mxu0 %vm240_vm2, %v725_v22 }
 0x5aa   :  { %1643 = vmatprep.mubr.msk.bf16.mxu0 %vm1882_vm1, %v1881_v15 }
 0x5e2   :  { %v817_v23 = vpop.f32.mrb[20].mxu0 }
 0x5e3   :  { %v1593_v24 = vpop.f32.mrb[21].mxu0 }
 0x5e4   :  { %v820_v25 = vpop.f32.mrb[22].mxu0 }
 0x5e5   :  { %v1594_v26 = vpop.f32.mrb[23].mxu0 }
 0x5e6   :  { %v769_v27 = vpop.f32.mrb[16].mxu1 }
 0x5e7   :  { %v1587_v28 = vpop.f32.mrb[17].mxu1 }
 0x5e8   :  { %v772_v29 = vpop.f32.mrb[18].mxu1 }
 0x5e9   :  { %v1588_v30 = vpop.f32.mrb[19].mxu1 }
 0x63b   :  { %v865_v31 = vpop.f32.mrb[20].mxu1 }
 0x63c   :  { %v1599_v32 = vpop.f32.mrb[21].mxu1 }
 0x63d   :  { %v868_v33 = vpop.f32.mrb[22].mxu1 }
 0x63e   :  { %v1600_v34 = vpop.f32.mrb[23].mxu1 }
 0x63f   :  { %v913_v35 = vpop.f32.mrb[24].mxu0  ;;  %v1709_v34 = vld [vmem:[%s2318_s9] sm:$0xff]  }
 0x640   :  { %v1690_v36 = vpack.i.bf16 %v913_v35, %v865_v31  ;;  %v1605_v38 = vpop.f32.mrb[25].mxu0  ;;  %1640 = vmatpush3.bf16.msra.mxu0 %v1709_v34  ;;  %v1710_v35 = vld [vmem:[%s2318_s9 + $0x8] sm:$0xff]  }
 0x641   :  { %v916_v39 = vpop.f32.mrb[26].mxu0  ;;  %1641 = vmatprep.subr.bf16.mxu0 %v1881_v15 }
 0x642   :  { %1691 = vrot.lane.b32.xlu1 %v1690_v36, %s1888_s26  ;;  %v1606_v40 = vpop.f32.mrb[27].mxu0 }
 0x643   :  { %v961_v41 = vpop.f32.mrb[24].mxu1 }
 0x644   :  { %v1611_v55 = vpop.f32.mrb[25].mxu1  ;;  %1642 = vmatpush3.bf16.msra.mxu0 %v1710_v35 }
 0x645   :  { %v964_v43 = vpop.f32.mrb[26].mxu1 }
 0x646   :  { %v1612_v62 = vpop.f32.mrb[27].mxu1 }
 0x64b   :  { %v1057_v37 = vpop.f32.mrb[28].mxu1 }
 0x64c   :  { %v1623_v44 = vpop.f32.mrb[29].mxu1 }
 0x64d   :  { %v1060_v45 = vpop.f32.mrb[30].mxu1 }
 0x64e   :  { %v1624_v46 = vpop.f32.mrb[31].mxu1 }
 0x674   :  { %v1009_v49 = vpop.f32.mrb[28].mxu0 }
 0x675   :  { %v1695_v52 = vpack.i.bf16 %v1009_v49, %v961_v41  ;;  %v1617_v53 = vpop.f32.mrb[29].mxu0 }
 0x676   :  { %v1012_v54 = vpop.f32.mrb[30].mxu0 }
 0x677   :  { %1696 = vrot.lane.b32.xlu0 %v1695_v52, %s1889_s23  ;;  %v1618_v57 = vpop.f32.mrb[31].mxu0  ;;  %v1711_v54 = vld [vmem:[%s2320_s11] sm:$0xff]  }
 0x678   :  { %v1712_v57 = vld [vmem:[%s2320_s11 + $0x8] sm:$0xff]  }
 0x67c   :  { %v1105_v58 = vpop.f32.mrb[32].mxu0 }
 0x67d   :  { %v1700_v59 = vpack.i.bf16 %v1105_v58, %v1057_v37  ;;  %v1629_v60 = vpop.f32.mrb[33].mxu0  ;;  %v1469_v37 = vld [vmem:[#allocation7] ss:$0 sm:$0xff]  ;;  %v1713_v58 = vld [vmem:[%s2320_s11 + $0x10] sm:$0xff]  }
 0x67e   :  { %v1108_v63 = vpop.f32.mrb[34].mxu0  ;;  %v1471_v60 = vld [vmem:[%s2319_s10] ss:$0 sm:$0xff] }
 0x67f   :  { %1701 = vrot.lane.b32.xlu1 %v1700_v59, %s1890_s7  ;;  %v1630_v2 = vpop.f32.mrb[35].mxu0  ;;  %v1714_v59 = vld [vmem:[%s2320_s11 + $0x18] sm:$0xff]  }
 0x6b4   :  { %v1692_v3 = vpop.permute.xlu1 %1691 }
 0x6b5   :  { %v1694_v5 = vunpack.i.h.bf16 %v1692_v3  ;;  %v1693_v61 = vunpack.i.l.bf16 %v1692_v3 }
 0x6b7   :  { %v1136_v9 = vsel %vm240_vm2, %v817_v23, %v1694_v5  ;;  %v1135_v50 = vsel %vm240_vm2, %v769_v27, %v1693_v61 }
 0x6e9   :  { %v1697_v4 = vpop.permute.xlu0 %1696 }
 0x6ea   :  { %v1699_v6 = vunpack.i.h.bf16 %v1697_v4  ;;  %v1698_v7 = vunpack.i.l.bf16 %v1697_v4 }
 0x6ec   :  { %v1139_v10 = vsel %vm1137_vm4, %v1136_v9, %v1699_v6  ;;  %v1138_v11 = vsel %vm1137_vm4, %v1135_v50, %v1698_v7 }
 0x6f1   :  { %v1702_v8 = vpop.permute.xlu1 %1701 }
 0x6f2   :  { %v1704_v42 = vunpack.i.h.bf16 %v1702_v8  ;;  %v1703_v51 = vunpack.i.l.bf16 %v1702_v8 }
 0x6f4   :  { %v1142_v12 = vsel %vm1140_vm5, %v1139_v10, %v1704_v42  ;;  %v1141_v13 = vsel %vm1140_vm5, %v1138_v11, %v1703_v51 }
 0x6f5   :  { %v1143_v14 = vpack.c.bf16 %v1142_v12, %v1141_v13  ;;  %v1475_v13 = vld [vmem:[%s2321_s12] ss:$0 sm:$0xff] }
 0x6f7   :  { %1636 = vmatmul.mubr.msk.bf16.vlgmr.msra.gmra.mrb[32].mxu1 %vm97_vm0, %v1143_v14 }
 0x6f8   :  { %1655 = vmatprep.mubr.msk.bf16.mxu1 %vm1882_vm1, %v1881_v15  ;;  %1648 = vmatpush3.bf16.msra.mxu1 %v1711_v54 }
 0x6f9   :  { %1649 = vmatprep.subr.bf16.mxu1 %v1881_v15 }
 0x6fc   :  { %1650 = vmatpush3.bf16.msra.mxu1 %v1712_v57 }
 0x6fd   :  { %1651 = vmatprep.subr.bf16.mxu1 %v1881_v15 }
 0x700   :  { %1652 = vmatpush3.bf16.msra.mxu1 %v1713_v58 }
 0x701   :  { %1653 = vmatprep.subr.bf16.mxu1 %v1881_v15 }
 0x704   :  { %1654 = vmatpush3.bf16.msra.mxu1 %v1714_v59 }
 0x7ca   :  { %v1204_v17 = vpop.f32.mrb[32].mxu1 }
 0x7cb   :  { %v1205_v18 = vadd.f32 %v1465_v16, %v1204_v17  ;;  %v1637_v19 = vpop.f32.mrb[33].mxu1 }
 0x7cc   :  { %v1207_v20 = vpop.f32.mrb[34].mxu1 }
 0x7cd   :  { %v2250_v21 = vadd.f32 %v1205_v18, %v2014_v0  ;;  %v1208_v56 = vadd.f32 %v1465_v16, %v1207_v20  ;;  %v1638_v22 = vpop.f32.mrb[35].mxu1 }
 0x7cf   :  { %v2253_v23 = vadd.f32 %v1208_v56, %v2019_v1  ;;  %v1215_v24 = vsel %vm97_vm0, %v2250_v21, 0.0 }
 0x7d0   :  { %1216 = vadd.xlane.f32.xlu0 %v1215_v24 }
 0x7d1   :  { %v1218_v25 = vsel %vm97_vm0, %v2253_v23, 0.0 }
 0x7d2   :  { %1219 = vadd.xlane.f32.xlu1 %v1218_v25 }
 0x85d   :  { %v1217_v26 = vpop.xlane.xlu0 %1216 }
 0x85e   :  { %v1221_v27 = vmul.f32 0.03125, %v1217_v26 }
 0x85f   :  { %v1220_v28 = vpop.xlane.xlu1 %1219 }
 0x860   :  { %v1223_v29 = vsub.f32 %v2250_v21, %v1221_v27  ;;  %v1222_v0 = vmul.f32 0.03125, %v1220_v28 }
 0x862   :  { %v1224_v30 = vsub.f32 %v2253_v23, %v1222_v0  ;;  %v1225_v31 = vmul.f32 %v1223_v29, %v1223_v29 }
 0x864   :  { %v1227_v1 = vsel %vm97_vm0, %v1225_v31, 0.0  ;;  %v1226_v32 = vmul.f32 %v1224_v30, %v1224_v30 }
 0x865   :  { %1228 = vadd.xlane.f32.xlu0 %v1227_v1 }
 0x866   :  { %v1230_v33 = vsel %vm97_vm0, %v1226_v32, 0.0 }
 0x869   :  { %1231 = vadd.xlane.f32.xlu0 %v1230_v33 }
 0x8f2   :  { %v1229_v36 = vpop.xlane.xlu0 %1228 }
 0x8f3   :  { %v1233_v38 = vmul.f32 0.03125, %v1229_v36 }
 0x8f5   :  { %v1235_v39 = vadd.f32 1e-05, %v1233_v38 }
 0x8f6   :  { %v1232_v40 = vpop.xlane.xlu0 %1231 }
 0x8f7   :  { %1751 = vrsqrt.f32 %v1235_v39  ;;  %v1234_v41 = vmul.f32 0.03125, %v1232_v40 }
 0x8f9   :  { %v1236_v55 = vadd.f32 1e-05, %v1234_v41 }
 0x8fb   :  { %1753 = vrsqrt.f32 %v1236_v55 }
 0x901   :  { %v1752_v43 = vpop.eup %1751 }
 0x902   :  { %v1239_v62 = vmul.f32 %v1752_v43, %v1223_v29 }
 0x904   :  { %v1247_v45 = vmul.f32 %v1469_v37, %v1239_v62 }
 0x905   :  { %v1754_v44 = vpop.eup %1753 }
 0x906   :  { %v1240_v46 = vmul.f32 %v1754_v44, %v1224_v30  ;;  %v1255_v49 = vadd.f32 %v1470_v47, %v1247_v45 }
 0x908   :  { %v1248_v48 = vmul.f32 %v1469_v37, %v1240_v46 }
 0x90a   :  { %v1256_v52 = vadd.f32 %v1470_v47, %v1248_v48 }
 0x90c   :  { %v1257_v53 = vpack.c.bf16 %v1256_v52, %v1255_v49 }
 0x90e   :  { %1644 = vmatmul.mubr.msk.bf16.vlgmr.msra.gmra.mrb[36].mxu0 %vm97_vm0, %v1257_v53 }
 0x9e1   :  { %v1318_v63 = vpop.f32.mrb[36].mxu0 }
 0x9e2   :  { %v1319_v2 = vadd.f32 %v1471_v60, %v1318_v63  ;;  %v1645_v3 = vpop.f32.mrb[37].mxu0 }
 0x9e3   :  { %v1321_v4 = vpop.f32.mrb[38].mxu0 }
 0x9e4   :  { %v1327_v5 = vmul.f32 0.70710677, %v1319_v2  ;;  %v1322_v61 = vadd.f32 %v1471_v60, %v1321_v4  ;;  %v1646_v6 = vpop.f32.mrb[39].mxu0  ;;  %v1325_v50 = vmul.f32 0.5, %v1319_v2 }
 0x9e6   :  { %1755 = verf.f32 %v1327_v5  ;;  %v1328_v7 = vmul.f32 0.70710677, %v1322_v61  ;;  %v1326_v42 = vmul.f32 0.5, %v1322_v61 }
 0x9e8   :  { %1757 = verf.f32 %v1328_v7 }
 0x9f0   :  { %v1756_v15 = vpop.eup %1755 }
 0x9f1   :  { %v1331_v8 = vadd.f32 1.0, %v1756_v15 }
 0x9f2   :  { %v1758_v9 = vpop.eup %1757 }
 0x9f3   :  { %v1332_v51 = vadd.f32 1.0, %v1758_v9  ;;  %v1333_v10 = vmul.f32 %v1331_v8, %v1325_v50 }
 0x9f5   :  { %v1334_v11 = vmul.f32 %v1332_v51, %v1326_v42 }
 0x9f7   :  { %v1335_v12 = vpack.c.bf16 %v1334_v11, %v1333_v10 }
 0x9f9   :  { %1656 = vmatmul.mubr.msk.bf16.vlgmr.msra.gmra.mrb[36].mxu1 %vm1375_vm6, %v1335_v12 }
 0xacc   :  { %v1413_v14 = vpop.f32.mrb[36].mxu1 }
 0xacd   :  { %v1414_v16 = vadd.f32 %v1475_v13, %v1413_v14  ;;  %v1657_v17 = vpop.f32.mrb[37].mxu1 }
 0xace   :  { %v1416_v18 = vpop.f32.mrb[38].mxu1 }
 0xacf   :  { %v1420_v19 = vadd.f32 %v1414_v16, %v2250_v21  ;;  %v1417_v20 = vadd.f32 %v1475_v13, %v1416_v18  ;;  %v1658_v56 = vpop.f32.mrb[39].mxu1 }
 0xad1   :  { %1422 = vst.msk [vmem:[#allocation10] sm:$0xff] %vm97_vm0, %v1420_v19  ;;  %v1421_v22 = vadd.f32 %v1417_v20, %v2253_v23 }
 0xad3   :  { %1423 = vst.msk [vmem:[#allocation10 + $0x8] sm:$0xff] %vm97_vm0, %v1421_v22 }
 0xad4   :  { %1858 = shalt.err (!%p1855_p8)
}
 0xad5   :  { %s1859_s16 = scalar_lea.hbm %s2322_s13, 256 }
 0xad6   :  { %p1860_p9 = scmp.ne.s32.totalorder %s2322_s13, %s1859_s16  ;;  %p1863_p10 = scmp.lt.u32.totalorder %s1859_s16, %s2322_s13 }
 0xad8   :  { %p1865_p11 = pnand %p1863_p10, %p1860_p9 }
 0xada   :  { %1868 = shalt.err (!%p1865_p11)
}
 0xadb   :  { %s1892_s22 = smov 128  }
 0xadc   :  { %1435 = dma.vmem_to_hbm [thread:$0]  %s1430_s1, 256, %s2322_s13, [#allocation4], %s1892_s22, %s1892_s22, %s1888_s26  }
 0xadd   :  { %1875 = dma.done.wait [#allocation4], 256  }
 0xade   :  { %1876 = vsyncadd [#allocation4], 4294967040 }
 0xadf   :  { %1439 = vsyncpa [#allocation3], 1 }
 0xae0   :  { %1440 = vsyncpa [#allocation6], 1 }
 0xae1   :  { %1441 = vsyncpa [#allocation9], 1 }
 0xae2   :  { %1442 = vsyncpa [#allocation4], 1 }

</bundles_post_ra>
